<compile_context>
chip_gen: v5e
topology: v5e:2x2
jax: 0.10.0
libtpu: 0.0.40
codegen_flags: <defaults>
</compile_context>

<pallas_src>
import jax
import jax.numpy as jnp
import numpy as np
from jax.experimental import pallas as pl
from jax.experimental.pallas import tpu as pltpu


# ---------------------------------------------------------------------------
# Batch tiling
# ---------------------------------------------------------------------------
def _round_up(x, m):
    return (x + m - 1) // m * m


def _batch_tiling(n, tb_max=64):
    """Batch tile (multiple of 8, <= tb_max, >=2 grid blocks when batch allows)."""
    n8 = _round_up(n, 8)
    half = _round_up((n8 + 1) // 2, 8)          # aim for >=2 blocks (v7x megacore)
    tb = max(8, min(tb_max, half))
    n_pad = _round_up(n8, tb)
    return tb, n_pad


# ---------------------------------------------------------------------------
# Single fused kernel: conv1+ReLU+pool -> conv2+ReLU+pool -> fc1 -> fc2 -> fc3
#
# Activation layout inside the kernel: (H, tb, W*C)  (H leading, batch on sublanes,
# (w, c) interleaved on lanes with c minor). Weights were repacked at init so that:
#   w1_ref[dx*3+kh] : (30, 14*6)   block-diag, folds kw-sum and x-pool tap dx for conv1
#   w2_ref[dx*5+kh] : (14*6, 5*16) block-diag, folds kw-sum and x-pool tap dx for conv2
#   fc1w_ref[py]    : (5*16, 120)  fc1 rows for pooled row py (NHWC->torch-CHW permute folded in)
#   fc3w_ref        : (84, 128)    zero-padded to 128 lanes (lane-dense output store)
# ---------------------------------------------------------------------------
def _cnn_fused_kernel(x_ref, w1_ref, b1_ref, w2_ref, b2_ref,
                      fc1w_ref, fc1b_ref, fc2w_ref, fc2b_ref,
                      fc3w_ref, fc3b_ref, o_ref):
    tb = x_ref.shape[1]
    f32 = jnp.float32

    x = x_ref[...]                                             # (30, tb, 30) padded input

    # ---- conv1 (3x3, pad=1) + bias + ReLU + 2x2/2 max pool -> a1: (14, tb, 14*6) ----
    def conv1_tap(dx):                                         # pool tap in x folded into weights
        acc = None
        for kh in range(3):                                    # kh-shift = leading-dim slice
            lhs = x[kh:kh + 28].reshape(28 * tb, 30)
            r = jnp.dot(lhs, w1_ref[dx * 3 + kh], preferred_element_type=f32)
            acc = r if acc is None else acc + r
        return acc                                             # (28*tb, 84) rows = (y, n)

    s = jnp.maximum(conv1_tap(0), conv1_tap(1)).reshape(14, 2, tb, 84)
    s = jnp.maximum(s[:, 0], s[:, 1])                          # pool tap in y -> (14, tb, 84)
    a1 = jnp.maximum(s + b1_ref[...], 0.0)                     # relu(max(conv)+b) == pool(relu(conv+b))

    # ---- conv2 (5x5, pad=0) + bias + ReLU + 2x2/2 max pool -> a2: (5, tb, 5*16) ----
    def conv2_tap(dx):
        acc = None
        for kh in range(5):
            lhs = a1[kh:kh + 10].reshape(10 * tb, 84)
            r = jnp.dot(lhs, w2_ref[dx * 5 + kh], preferred_element_type=f32)
            acc = r if acc is None else acc + r
        return acc                                             # (10*tb, 80) rows = (y, n)

    t = jnp.maximum(conv2_tap(0), conv2_tap(1)).reshape(5, 2, tb, 80)
    t = jnp.maximum(t[:, 0], t[:, 1])                          # (5, tb, 80)
    a2 = jnp.maximum(t + b2_ref[...], 0.0)

    # ---- fc1 -> fc2 -> fc3 (no activations in between, as in the module) ----
    h = None
    for py in range(5):                                        # sum over pooled rows = fc1 matmul
        r = jnp.dot(a2[py], fc1w_ref[py], preferred_element_type=f32)
        h = r if h is None else h + r
    h = h + fc1b_ref[...]                                      # (tb, 120)
    h = jnp.dot(h, fc2w_ref[...], preferred_element_type=f32) + fc2b_ref[...]   # (tb, 84)
    h = jnp.dot(h, fc3w_ref[...], preferred_element_type=f32) + fc3b_ref[...]   # (tb, 128)
    o_ref[...] = h.astype(o_ref.dtype)


def cnn_forward(x_nchw, pp):
    n, cin, hh, ww = x_nchw.shape
    assert cin == 1 and hh == 28 and ww == 28, "CNN(1,10) hard-codes fc1 in_features=400 => 1x28x28 input"
    tb, n_pad = _batch_tiling(n)

    # Only per-forward glue: squeeze channel, apply conv1's padding=1, pad batch, put H leading.
    x = x_nchw.reshape(n, 28, 28)
    x = jnp.pad(x, ((0, n_pad - n), (1, 1), (1, 1)))           # (n_pad, 30, 30)
    x = jnp.transpose(x, (1, 0, 2))                            # (30, n_pad, 30)

    out = pl.pallas_call(
        _cnn_fused_kernel,
        out_shape=jax.ShapeDtypeStruct((n_pad, 128), jnp.float32),
        grid=(n_pad // tb,),
        in_specs=[
            pl.BlockSpec((30, tb, 30), lambda i: (0, i, 0)),    # input tile (H, tb, W)
            pl.BlockSpec((6, 30, 84), lambda i: (0, 0, 0)),     # conv1 block-diag weights
            pl.BlockSpec((1, 84), lambda i: (0, 0)),            # conv1 bias (tiled over px)
            pl.BlockSpec((10, 84, 80), lambda i: (0, 0, 0)),    # conv2 block-diag weights
            pl.BlockSpec((1, 80), lambda i: (0, 0)),            # conv2 bias (tiled over px)
            pl.BlockSpec((5, 80, 120), lambda i: (0, 0, 0)),    # fc1 weights split per pooled row
            pl.BlockSpec((1, 120), lambda i: (0, 0)),
            pl.BlockSpec((120, 84), lambda i: (0, 0)),
            pl.BlockSpec((1, 84), lambda i: (0, 0)),
            pl.BlockSpec((84, 128), lambda i: (0, 0)),          # fc3 padded to 128 lanes
            pl.BlockSpec((1, 128), lambda i: (0, 0)),
        ],
        out_specs=pl.BlockSpec((tb, 128), lambda i: (i, 0)),
        compiler_params=pltpu.CompilerParams(
            dimension_semantics=("parallel",),
            vmem_limit_bytes=32 * 1024 * 1024,
        ),
    )(x, pp["w1bd"], pp["b1row"], pp["w2bd"], pp["b2row"],
      pp["fc1w"], pp["fc1b"], pp["fc2w"], pp["fc2b"], pp["fc3w"], pp["fc3b"])
    return out[:n, :10]


# ---------------------------------------------------------------------------
# Parameters (torch layout) + one-time repack into the fused-kernel layout
# ---------------------------------------------------------------------------
def init_params(key):
    ks = jax.random.split(key, 10)

    def u(k, shape, fan_in):
        bound = 1.0 / (fan_in ** 0.5)
        return jax.random.uniform(k, shape, jnp.float32, -bound, bound)

    return {
        "w1": u(ks[0], (6, 1, 3, 3), 1 * 3 * 3),
        "b1": u(ks[1], (6,), 1 * 3 * 3),
        "w2": u(ks[2], (16, 6, 5, 5), 6 * 5 * 5),
        "b2": u(ks[3], (16,), 6 * 5 * 5),
        "fc1_w": u(ks[4], (400, 120), 400),   # transpose of torch Linear.weight
        "fc1_b": u(ks[5], (120,), 400),
        "fc2_w": u(ks[6], (120, 84), 120),
        "fc2_b": u(ks[7], (84,), 120),
        "fc3_w": u(ks[8], (84, 10), 84),
        "fc3_b": u(ks[9], (10,), 84),
    }


def prepare_params(p):
    """One-time weight repack (block-diag conv weights that fold kw-sum + x-pool taps,
    per-pooled-row fc1 split, lane-padded fc3, px-tiled biases)."""
    w1 = np.asarray(p["w1"], np.float32)       # (6,1,3,3)  OIHW
    b1 = np.asarray(p["b1"], np.float32)
    w2 = np.asarray(p["w2"], np.float32)       # (16,6,5,5) OIHW
    b2 = np.asarray(p["b2"], np.float32)
    f1w = np.asarray(p["fc1_w"], np.float32)   # (400,120), rows in torch CHW order
    f1b = np.asarray(p["fc1_b"], np.float32)
    f2w = np.asarray(p["fc2_w"], np.float32)
    f2b = np.asarray(p["fc2_b"], np.float32)
    f3w = np.asarray(p["fc3_w"], np.float32)
    f3b = np.asarray(p["fc3_b"], np.float32)

    # conv1: W1bd[dx,kh][x_in, px*6+co] = w1[co,0,kh, x_in-2px-dx]  (0 <= kw <= 2)
    w1bd = np.zeros((2, 3, 30, 14 * 6), np.float32)
    for dx in range(2):
        for kh in range(3):
            for px in range(14):
                for kw in range(3):
                    xi = 2 * px + dx + kw
                    w1bd[dx, kh, xi, px * 6:(px + 1) * 6] = w1[:, 0, kh, kw]
    b1row = np.tile(b1, 14)[None, :]                               # (1, 84)

    # conv2: W2bd[dx,kh][x_in*6+c, px*16+co] = w2[co,c,kh, x_in-2px-dx]  (0 <= kw <= 4)
    w2bd = np.zeros((2, 5, 14 * 6, 5 * 16), np.float32)
    for dx in range(2):
        for kh in range(5):
            for px in range(5):
                for kw in range(5):
                    xi = 2 * px + dx + kw
                    w2bd[dx, kh, xi * 6:(xi + 1) * 6, px * 16:(px + 1) * 16] = w2[:, :, kh, kw].T
    b2row = np.tile(b2, 5)[None, :]                                # (1, 80)

    # fc1 split per pooled row py: rows indexed (px*16 + c) -> torch index c*25 + py*5 + px
    f1w_py = np.zeros((5, 5 * 16, 120), np.float32)
    for py in range(5):
        for px in range(5):
            for c in range(16):
                f1w_py[py, px * 16 + c, :] = f1w[c * 25 + py * 5 + px, :]

    # fc3 zero-padded to 128 output lanes (lane-dense HBM store); wrapper slices [:, :10]
    f3w_pad = np.zeros((84, 128), np.float32)
    f3w_pad[:, :10] = f3w
    f3b_pad = np.zeros((1, 128), np.float32)
    f3b_pad[0, :10] = f3b

    return {
        "w1bd": jnp.asarray(w1bd.reshape(6, 30, 84)),
        "b1row": jnp.asarray(b1row),
        "w2bd": jnp.asarray(w2bd.reshape(10, 84, 80)),
        "b2row": jnp.asarray(b2row),
        "fc1w": jnp.asarray(f1w_py),
        "fc1b": jnp.asarray(f1b[None, :]),
        "fc2w": jnp.asarray(f2w),
        "fc2b": jnp.asarray(f2b[None, :]),
        "fc3w": jnp.asarray(f3w_pad),
        "fc3b": jnp.asarray(f3b_pad),
    }


# ---------------------------------------------------------------------------
# Pure-JAX reference (mirrors the PyTorch module exactly, NCHW) for a sanity check
# ---------------------------------------------------------------------------
def _reference_forward(x_nchw, p):
    dn1 = jax.lax.conv_dimension_numbers(x_nchw.shape, p["w1"].shape, ("NCHW", "OIHW", "NCHW"))
    y = jax.lax.conv_general_dilated(x_nchw, p["w1"], (1, 1), ((1, 1), (1, 1)),
                                     dimension_numbers=dn1)
    y = jax.nn.relu(y + p["b1"][None, :, None, None])
    y = jax.lax.reduce_window(y, -jnp.inf, jax.lax.max, (1, 1, 2, 2), (1, 1, 2, 2), "VALID")
    dn2 = jax.lax.conv_dimension_numbers(y.shape, p["w2"].shape, ("NCHW", "OIHW", "NCHW"))
    y = jax.lax.conv_general_dilated(y, p["w2"], (1, 1), ((0, 0), (0, 0)),
                                     dimension_numbers=dn2)
    y = jax.nn.relu(y + p["b2"][None, :, None, None])
    y = jax.lax.reduce_window(y, -jnp.inf, jax.lax.max, (1, 1, 2, 2), (1, 1, 2, 2), "VALID")
    y = y.reshape(y.shape[0], -1)                                  # torch .view(N, C*H*W)
    y = y @ p["fc1_w"] + p["fc1_b"]
    y = y @ p["fc2_w"] + p["fc2_b"]
    y = y @ p["fc3_w"] + p["fc3_b"]
    return y


if __name__ == "__main__":
    key = jax.random.PRNGKey(0)
    kx, kp = jax.random.split(key)
    # Module hard-codes fc input = 400 => 1x28x28 input (MNIST), NCHW like PyTorch.
    x = jax.random.normal(kx, (2, 1, 28, 28), jnp.float32)
    params = init_params(kp)
    pp = prepare_params(params)     # one-time weight repack (not in the per-step path)

    out = jax.jit(cnn_forward)(x, pp)
    out = jax.block_until_ready(out)
    assert out.shape == (2, 10) and out.dtype == jnp.float32

    ref = jax.block_until_ready(_reference_forward(x, params))
    assert jnp.allclose(out, ref, rtol=5e-2, atol=5e-2), (
        "Pallas forward mismatch vs pure-JAX reference")

    print("KERNEL_OK")
</pallas_src>

<mosaic_0001>
module attributes {stable_mosaic.version = 11 : i64} {
  func.func @_cnn_fused_kernel(%arg0: i32, %arg1: memref<30x8x30xf32, #tpu.memory_space<vmem>>, %arg2: memref<6x30x84xf32, #tpu.memory_space<vmem>>, %arg3: memref<1x84xf32, #tpu.memory_space<vmem>>, %arg4: memref<10x84x80xf32, #tpu.memory_space<vmem>>, %arg5: memref<1x80xf32, #tpu.memory_space<vmem>>, %arg6: memref<5x80x120xf32, #tpu.memory_space<vmem>>, %arg7: memref<1x120xf32, #tpu.memory_space<vmem>>, %arg8: memref<120x84xf32, #tpu.memory_space<vmem>>, %arg9: memref<1x84xf32, #tpu.memory_space<vmem>>, %arg10: memref<84x128xf32, #tpu.memory_space<vmem>>, %arg11: memref<1x128xf32, #tpu.memory_space<vmem>>, %arg12: memref<8x128xf32, #tpu.memory_space<vmem>>) attributes {dimension_semantics = [#tpu.dimension_semantics<parallel>], iteration_bounds = array<i64: 1>, scalar_prefetch = 0 : i64, scratch_operands = 0 : i64, tpu.core_type = #tpu.core_type<tc>, window_params = [{transform_indices = @transform_0, window_bounds = array<i64: 30, 8, 30>}, {pipeline_mode = #tpu.pipeline_mode<synchronous>, transform_indices = @transform_1, window_bounds = array<i64: 6, 30, 84>}, {pipeline_mode = #tpu.pipeline_mode<synchronous>, transform_indices = @transform_2, window_bounds = array<i64: 1, 84>}, {pipeline_mode = #tpu.pipeline_mode<synchronous>, transform_indices = @transform_3, window_bounds = array<i64: 10, 84, 80>}, {pipeline_mode = #tpu.pipeline_mode<synchronous>, transform_indices = @transform_4, window_bounds = array<i64: 1, 80>}, {pipeline_mode = #tpu.pipeline_mode<synchronous>, transform_indices = @transform_5, window_bounds = array<i64: 5, 80, 120>}, {pipeline_mode = #tpu.pipeline_mode<synchronous>, transform_indices = @transform_6, window_bounds = array<i64: 1, 120>}, {pipeline_mode = #tpu.pipeline_mode<synchronous>, transform_indices = @transform_7, window_bounds = array<i64: 120, 84>}, {pipeline_mode = #tpu.pipeline_mode<synchronous>, transform_indices = @transform_8, window_bounds = array<i64: 1, 84>}, {pipeline_mode = #tpu.pipeline_mode<synchronous>, transform_indices = @transform_9, window_bounds = array<i64: 84, 128>}, {pipeline_mode = #tpu.pipeline_mode<synchronous>, transform_indices = @transform_10, window_bounds = array<i64: 1, 128>}, {transform_indices = @transform_11, window_bounds = array<i64: 8, 128>}]} {
    %c0 = arith.constant 0 : index
    %c0_0 = arith.constant 0 : index
    %c0_1 = arith.constant 0 : index
    %0 = vector.load %arg1[%c0, %c0_0, %c0_1] : memref<30x8x30xf32, #tpu.memory_space<vmem>>, vector<30x8x30xf32>
    %1 = vector.extract_strided_slice %0 {offsets = [0, 0, 0], sizes = [28, 8, 30], strides = [1, 1, 1]} : vector<30x8x30xf32> to vector<28x8x30xf32>
    %2 = vector.shape_cast %1 : vector<28x8x30xf32> to vector<224x30xf32>
    %c0_2 = arith.constant 0 : index
    %c0_3 = arith.constant 0 : index
    %c0_4 = arith.constant 0 : index
    %3 = vector.load %arg2[%c0_2, %c0_3, %c0_4] : memref<6x30x84xf32, #tpu.memory_space<vmem>>, vector<1x30x84xf32>
    %4 = vector.shape_cast %3 : vector<1x30x84xf32> to vector<30x84xf32>
    %cst = arith.constant dense<0.000000e+00> : vector<224x84xf32>
    %5 = tpu.matmul %2, %4, %cst {dimension_numbers = #tpu.dot_dimension_numbers<[1], [0], [0], [1], [0, 0, 1, 1], [], []>} : vector<224x30xf32>, vector<30x84xf32>, vector<224x84xf32> -> vector<224x84xf32>
    %6 = vector.extract_strided_slice %0 {offsets = [1, 0, 0], sizes = [28, 8, 30], strides = [1, 1, 1]} : vector<30x8x30xf32> to vector<28x8x30xf32>
    %7 = vector.shape_cast %6 : vector<28x8x30xf32> to vector<224x30xf32>
    %c1 = arith.constant 1 : index
    %c0_5 = arith.constant 0 : index
    %c0_6 = arith.constant 0 : index
    %8 = vector.load %arg2[%c1, %c0_5, %c0_6] : memref<6x30x84xf32, #tpu.memory_space<vmem>>, vector<1x30x84xf32>
    %9 = vector.shape_cast %8 : vector<1x30x84xf32> to vector<30x84xf32>
    %cst_7 = arith.constant dense<0.000000e+00> : vector<224x84xf32>
    %10 = tpu.matmul %7, %9, %cst_7 {dimension_numbers = #tpu.dot_dimension_numbers<[1], [0], [0], [1], [0, 0, 1, 1], [], []>} : vector<224x30xf32>, vector<30x84xf32>, vector<224x84xf32> -> vector<224x84xf32>
    %11 = arith.addf %5, %10 : vector<224x84xf32>
    %12 = vector.extract_strided_slice %0 {offsets = [2, 0, 0], sizes = [28, 8, 30], strides = [1, 1, 1]} : vector<30x8x30xf32> to vector<28x8x30xf32>
    %13 = vector.shape_cast %12 : vector<28x8x30xf32> to vector<224x30xf32>
    %c2 = arith.constant 2 : index
    %c0_8 = arith.constant 0 : index
    %c0_9 = arith.constant 0 : index
    %14 = vector.load %arg2[%c2, %c0_8, %c0_9] : memref<6x30x84xf32, #tpu.memory_space<vmem>>, vector<1x30x84xf32>
    %15 = vector.shape_cast %14 : vector<1x30x84xf32> to vector<30x84xf32>
    %cst_10 = arith.constant dense<0.000000e+00> : vector<224x84xf32>
    %16 = tpu.matmul %13, %15, %cst_10 {dimension_numbers = #tpu.dot_dimension_numbers<[1], [0], [0], [1], [0, 0, 1, 1], [], []>} : vector<224x30xf32>, vector<30x84xf32>, vector<224x84xf32> -> vector<224x84xf32>
    %17 = arith.addf %11, %16 : vector<224x84xf32>
    %18 = vector.extract_strided_slice %0 {offsets = [0, 0, 0], sizes = [28, 8, 30], strides = [1, 1, 1]} : vector<30x8x30xf32> to vector<28x8x30xf32>
    %19 = vector.shape_cast %18 : vector<28x8x30xf32> to vector<224x30xf32>
    %c3 = arith.constant 3 : index
    %c0_11 = arith.constant 0 : index
    %c0_12 = arith.constant 0 : index
    %20 = vector.load %arg2[%c3, %c0_11, %c0_12] : memref<6x30x84xf32, #tpu.memory_space<vmem>>, vector<1x30x84xf32>
    %21 = vector.shape_cast %20 : vector<1x30x84xf32> to vector<30x84xf32>
    %cst_13 = arith.constant dense<0.000000e+00> : vector<224x84xf32>
    %22 = tpu.matmul %19, %21, %cst_13 {dimension_numbers = #tpu.dot_dimension_numbers<[1], [0], [0], [1], [0, 0, 1, 1], [], []>} : vector<224x30xf32>, vector<30x84xf32>, vector<224x84xf32> -> vector<224x84xf32>
    %23 = vector.extract_strided_slice %0 {offsets = [1, 0, 0], sizes = [28, 8, 30], strides = [1, 1, 1]} : vector<30x8x30xf32> to vector<28x8x30xf32>
    %24 = vector.shape_cast %23 : vector<28x8x30xf32> to vector<224x30xf32>
    %c4 = arith.constant 4 : index
    %c0_14 = arith.constant 0 : index
    %c0_15 = arith.constant 0 : index
    %25 = vector.load %arg2[%c4, %c0_14, %c0_15] : memref<6x30x84xf32, #tpu.memory_space<vmem>>, vector<1x30x84xf32>
    %26 = vector.shape_cast %25 : vector<1x30x84xf32> to vector<30x84xf32>
    %cst_16 = arith.constant dense<0.000000e+00> : vector<224x84xf32>
    %27 = tpu.matmul %24, %26, %cst_16 {dimension_numbers = #tpu.dot_dimension_numbers<[1], [0], [0], [1], [0, 0, 1, 1], [], []>} : vector<224x30xf32>, vector<30x84xf32>, vector<224x84xf32> -> vector<224x84xf32>
    %28 = arith.addf %22, %27 : vector<224x84xf32>
    %29 = vector.extract_strided_slice %0 {offsets = [2, 0, 0], sizes = [28, 8, 30], strides = [1, 1, 1]} : vector<30x8x30xf32> to vector<28x8x30xf32>
    %30 = vector.shape_cast %29 : vector<28x8x30xf32> to vector<224x30xf32>
    %c5 = arith.constant 5 : index
    %c0_17 = arith.constant 0 : index
    %c0_18 = arith.constant 0 : index
    %31 = vector.load %arg2[%c5, %c0_17, %c0_18] : memref<6x30x84xf32, #tpu.memory_space<vmem>>, vector<1x30x84xf32>
    %32 = vector.shape_cast %31 : vector<1x30x84xf32> to vector<30x84xf32>
    %cst_19 = arith.constant dense<0.000000e+00> : vector<224x84xf32>
    %33 = tpu.matmul %30, %32, %cst_19 {dimension_numbers = #tpu.dot_dimension_numbers<[1], [0], [0], [1], [0, 0, 1, 1], [], []>} : vector<224x30xf32>, vector<30x84xf32>, vector<224x84xf32> -> vector<224x84xf32>
    %34 = arith.addf %28, %33 : vector<224x84xf32>
    %35 = arith.maximumf %17, %34 : vector<224x84xf32>
    %36 = vector.shape_cast %35 : vector<224x84xf32> to vector<14x2x8x84xf32>
    %37 = vector.extract_strided_slice %36 {offsets = [0, 0, 0, 0], sizes = [14, 1, 8, 84], strides = [1, 1, 1, 1]} : vector<14x2x8x84xf32> to vector<14x1x8x84xf32>
    %38 = vector.shape_cast %37 : vector<14x1x8x84xf32> to vector<14x8x84xf32>
    %39 = vector.extract_strided_slice %36 {offsets = [0, 1, 0, 0], sizes = [14, 1, 8, 84], strides = [1, 1, 1, 1]} : vector<14x2x8x84xf32> to vector<14x1x8x84xf32>
    %40 = vector.shape_cast %39 : vector<14x1x8x84xf32> to vector<14x8x84xf32>
    %41 = arith.maximumf %38, %40 : vector<14x8x84xf32>
    %c0_20 = arith.constant 0 : index
    %c0_21 = arith.constant 0 : index
    %42 = vector.load %arg3[%c0_20, %c0_21] : memref<1x84xf32, #tpu.memory_space<vmem>>, vector<1x84xf32>
    %43 = vector.shape_cast %42 : vector<1x84xf32> to vector<1x1x84xf32>
    %44 = vector.broadcast %43 : vector<1x1x84xf32> to vector<14x8x84xf32>
    %45 = arith.addf %41, %44 : vector<14x8x84xf32>
    %cst_22 = arith.constant 0.000000e+00 : f32
    %46 = vector.broadcast %cst_22 : f32 to vector<14x8x84xf32>
    %47 = arith.maximumf %45, %46 : vector<14x8x84xf32>
    %48 = vector.extract_strided_slice %47 {offsets = [0, 0, 0], sizes = [10, 8, 84], strides = [1, 1, 1]} : vector<14x8x84xf32> to vector<10x8x84xf32>
    %49 = vector.shape_cast %48 : vector<10x8x84xf32> to vector<80x84xf32>
    %c0_23 = arith.constant 0 : index
    %c0_24 = arith.constant 0 : index
    %c0_25 = arith.constant 0 : index
    %50 = vector.load %arg4[%c0_23, %c0_24, %c0_25] : memref<10x84x80xf32, #tpu.memory_space<vmem>>, vector<1x84x80xf32>
    %51 = vector.shape_cast %50 : vector<1x84x80xf32> to vector<84x80xf32>
    %cst_26 = arith.constant dense<0.000000e+00> : vector<80x80xf32>
    %52 = tpu.matmul %49, %51, %cst_26 {dimension_numbers = #tpu.dot_dimension_numbers<[1], [0], [0], [1], [0, 0, 1, 1], [], []>} : vector<80x84xf32>, vector<84x80xf32>, vector<80x80xf32> -> vector<80x80xf32>
    %53 = vector.extract_strided_slice %47 {offsets = [1, 0, 0], sizes = [10, 8, 84], strides = [1, 1, 1]} : vector<14x8x84xf32> to vector<10x8x84xf32>
    %54 = vector.shape_cast %53 : vector<10x8x84xf32> to vector<80x84xf32>
    %c1_27 = arith.constant 1 : index
    %c0_28 = arith.constant 0 : index
    %c0_29 = arith.constant 0 : index
    %55 = vector.load %arg4[%c1_27, %c0_28, %c0_29] : memref<10x84x80xf32, #tpu.memory_space<vmem>>, vector<1x84x80xf32>
    %56 = vector.shape_cast %55 : vector<1x84x80xf32> to vector<84x80xf32>
    %cst_30 = arith.constant dense<0.000000e+00> : vector<80x80xf32>
    %57 = tpu.matmul %54, %56, %cst_30 {dimension_numbers = #tpu.dot_dimension_numbers<[1], [0], [0], [1], [0, 0, 1, 1], [], []>} : vector<80x84xf32>, vector<84x80xf32>, vector<80x80xf32> -> vector<80x80xf32>
    %58 = arith.addf %52, %57 : vector<80x80xf32>
    %59 = vector.extract_strided_slice %47 {offsets = [2, 0, 0], sizes = [10, 8, 84], strides = [1, 1, 1]} : vector<14x8x84xf32> to vector<10x8x84xf32>
    %60 = vector.shape_cast %59 : vector<10x8x84xf32> to vector<80x84xf32>
    %c2_31 = arith.constant 2 : index
    %c0_32 = arith.constant 0 : index
    %c0_33 = arith.constant 0 : index
    %61 = vector.load %arg4[%c2_31, %c0_32, %c0_33] : memref<10x84x80xf32, #tpu.memory_space<vmem>>, vector<1x84x80xf32>
    %62 = vector.shape_cast %61 : vector<1x84x80xf32> to vector<84x80xf32>
    %cst_34 = arith.constant dense<0.000000e+00> : vector<80x80xf32>
    %63 = tpu.matmul %60, %62, %cst_34 {dimension_numbers = #tpu.dot_dimension_numbers<[1], [0], [0], [1], [0, 0, 1, 1], [], []>} : vector<80x84xf32>, vector<84x80xf32>, vector<80x80xf32> -> vector<80x80xf32>
    %64 = arith.addf %58, %63 : vector<80x80xf32>
    %65 = vector.extract_strided_slice %47 {offsets = [3, 0, 0], sizes = [10, 8, 84], strides = [1, 1, 1]} : vector<14x8x84xf32> to vector<10x8x84xf32>
    %66 = vector.shape_cast %65 : vector<10x8x84xf32> to vector<80x84xf32>
    %c3_35 = arith.constant 3 : index
    %c0_36 = arith.constant 0 : index
    %c0_37 = arith.constant 0 : index
    %67 = vector.load %arg4[%c3_35, %c0_36, %c0_37] : memref<10x84x80xf32, #tpu.memory_space<vmem>>, vector<1x84x80xf32>
    %68 = vector.shape_cast %67 : vector<1x84x80xf32> to vector<84x80xf32>
    %cst_38 = arith.constant dense<0.000000e+00> : vector<80x80xf32>
    %69 = tpu.matmul %66, %68, %cst_38 {dimension_numbers = #tpu.dot_dimension_numbers<[1], [0], [0], [1], [0, 0, 1, 1], [], []>} : vector<80x84xf32>, vector<84x80xf32>, vector<80x80xf32> -> vector<80x80xf32>
    %70 = arith.addf %64, %69 : vector<80x80xf32>
    %71 = vector.extract_strided_slice %47 {offsets = [4, 0, 0], sizes = [10, 8, 84], strides = [1, 1, 1]} : vector<14x8x84xf32> to vector<10x8x84xf32>
    %72 = vector.shape_cast %71 : vector<10x8x84xf32> to vector<80x84xf32>
    %c4_39 = arith.constant 4 : index
    %c0_40 = arith.constant 0 : index
    %c0_41 = arith.constant 0 : index
    %73 = vector.load %arg4[%c4_39, %c0_40, %c0_41] : memref<10x84x80xf32, #tpu.memory_space<vmem>>, vector<1x84x80xf32>
    %74 = vector.shape_cast %73 : vector<1x84x80xf32> to vector<84x80xf32>
    %cst_42 = arith.constant dense<0.000000e+00> : vector<80x80xf32>
    %75 = tpu.matmul %72, %74, %cst_42 {dimension_numbers = #tpu.dot_dimension_numbers<[1], [0], [0], [1], [0, 0, 1, 1], [], []>} : vector<80x84xf32>, vector<84x80xf32>, vector<80x80xf32> -> vector<80x80xf32>
    %76 = arith.addf %70, %75 : vector<80x80xf32>
    %77 = vector.extract_strided_slice %47 {offsets = [0, 0, 0], sizes = [10, 8, 84], strides = [1, 1, 1]} : vector<14x8x84xf32> to vector<10x8x84xf32>
    %78 = vector.shape_cast %77 : vector<10x8x84xf32> to vector<80x84xf32>
    %c5_43 = arith.constant 5 : index
    %c0_44 = arith.constant 0 : index
    %c0_45 = arith.constant 0 : index
    %79 = vector.load %arg4[%c5_43, %c0_44, %c0_45] : memref<10x84x80xf32, #tpu.memory_space<vmem>>, vector<1x84x80xf32>
    %80 = vector.shape_cast %79 : vector<1x84x80xf32> to vector<84x80xf32>
    %cst_46 = arith.constant dense<0.000000e+00> : vector<80x80xf32>
    %81 = tpu.matmul %78, %80, %cst_46 {dimension_numbers = #tpu.dot_dimension_numbers<[1], [0], [0], [1], [0, 0, 1, 1], [], []>} : vector<80x84xf32>, vector<84x80xf32>, vector<80x80xf32> -> vector<80x80xf32>
    %82 = vector.extract_strided_slice %47 {offsets = [1, 0, 0], sizes = [10, 8, 84], strides = [1, 1, 1]} : vector<14x8x84xf32> to vector<10x8x84xf32>
    %83 = vector.shape_cast %82 : vector<10x8x84xf32> to vector<80x84xf32>
    %c6 = arith.constant 6 : index
    %c0_47 = arith.constant 0 : index
    %c0_48 = arith.constant 0 : index
    %84 = vector.load %arg4[%c6, %c0_47, %c0_48] : memref<10x84x80xf32, #tpu.memory_space<vmem>>, vector<1x84x80xf32>
    %85 = vector.shape_cast %84 : vector<1x84x80xf32> to vector<84x80xf32>
    %cst_49 = arith.constant dense<0.000000e+00> : vector<80x80xf32>
    %86 = tpu.matmul %83, %85, %cst_49 {dimension_numbers = #tpu.dot_dimension_numbers<[1], [0], [0], [1], [0, 0, 1, 1], [], []>} : vector<80x84xf32>, vector<84x80xf32>, vector<80x80xf32> -> vector<80x80xf32>
    %87 = arith.addf %81, %86 : vector<80x80xf32>
    %88 = vector.extract_strided_slice %47 {offsets = [2, 0, 0], sizes = [10, 8, 84], strides = [1, 1, 1]} : vector<14x8x84xf32> to vector<10x8x84xf32>
    %89 = vector.shape_cast %88 : vector<10x8x84xf32> to vector<80x84xf32>
    %c7 = arith.constant 7 : index
    %c0_50 = arith.constant 0 : index
    %c0_51 = arith.constant 0 : index
    %90 = vector.load %arg4[%c7, %c0_50, %c0_51] : memref<10x84x80xf32, #tpu.memory_space<vmem>>, vector<1x84x80xf32>
    %91 = vector.shape_cast %90 : vector<1x84x80xf32> to vector<84x80xf32>
    %cst_52 = arith.constant dense<0.000000e+00> : vector<80x80xf32>
    %92 = tpu.matmul %89, %91, %cst_52 {dimension_numbers = #tpu.dot_dimension_numbers<[1], [0], [0], [1], [0, 0, 1, 1], [], []>} : vector<80x84xf32>, vector<84x80xf32>, vector<80x80xf32> -> vector<80x80xf32>
    %93 = arith.addf %87, %92 : vector<80x80xf32>
    %94 = vector.extract_strided_slice %47 {offsets = [3, 0, 0], sizes = [10, 8, 84], strides = [1, 1, 1]} : vector<14x8x84xf32> to vector<10x8x84xf32>
    %95 = vector.shape_cast %94 : vector<10x8x84xf32> to vector<80x84xf32>
    %c8 = arith.constant 8 : index
    %c0_53 = arith.constant 0 : index
    %c0_54 = arith.constant 0 : index
    %96 = vector.load %arg4[%c8, %c0_53, %c0_54] : memref<10x84x80xf32, #tpu.memory_space<vmem>>, vector<1x84x80xf32>
    %97 = vector.shape_cast %96 : vector<1x84x80xf32> to vector<84x80xf32>
    %cst_55 = arith.constant dense<0.000000e+00> : vector<80x80xf32>
    %98 = tpu.matmul %95, %97, %cst_55 {dimension_numbers = #tpu.dot_dimension_numbers<[1], [0], [0], [1], [0, 0, 1, 1], [], []>} : vector<80x84xf32>, vector<84x80xf32>, vector<80x80xf32> -> vector<80x80xf32>
    %99 = arith.addf %93, %98 : vector<80x80xf32>
    %100 = vector.extract_strided_slice %47 {offsets = [4, 0, 0], sizes = [10, 8, 84], strides = [1, 1, 1]} : vector<14x8x84xf32> to vector<10x8x84xf32>
    %101 = vector.shape_cast %100 : vector<10x8x84xf32> to vector<80x84xf32>
    %c9 = arith.constant 9 : index
    %c0_56 = arith.constant 0 : index
    %c0_57 = arith.constant 0 : index
    %102 = vector.load %arg4[%c9, %c0_56, %c0_57] : memref<10x84x80xf32, #tpu.memory_space<vmem>>, vector<1x84x80xf32>
    %103 = vector.shape_cast %102 : vector<1x84x80xf32> to vector<84x80xf32>
    %cst_58 = arith.constant dense<0.000000e+00> : vector<80x80xf32>
    %104 = tpu.matmul %101, %103, %cst_58 {dimension_numbers = #tpu.dot_dimension_numbers<[1], [0], [0], [1], [0, 0, 1, 1], [], []>} : vector<80x84xf32>, vector<84x80xf32>, vector<80x80xf32> -> vector<80x80xf32>
    %105 = arith.addf %99, %104 : vector<80x80xf32>
    %106 = arith.maximumf %76, %105 : vector<80x80xf32>
    %107 = vector.shape_cast %106 : vector<80x80xf32> to vector<5x2x8x80xf32>
    %108 = vector.extract_strided_slice %107 {offsets = [0, 0, 0, 0], sizes = [5, 1, 8, 80], strides = [1, 1, 1, 1]} : vector<5x2x8x80xf32> to vector<5x1x8x80xf32>
    %109 = vector.shape_cast %108 : vector<5x1x8x80xf32> to vector<5x8x80xf32>
    %110 = vector.extract_strided_slice %107 {offsets = [0, 1, 0, 0], sizes = [5, 1, 8, 80], strides = [1, 1, 1, 1]} : vector<5x2x8x80xf32> to vector<5x1x8x80xf32>
    %111 = vector.shape_cast %110 : vector<5x1x8x80xf32> to vector<5x8x80xf32>
    %112 = arith.maximumf %109, %111 : vector<5x8x80xf32>
    %c0_59 = arith.constant 0 : index
    %c0_60 = arith.constant 0 : index
    %113 = vector.load %arg5[%c0_59, %c0_60] : memref<1x80xf32, #tpu.memory_space<vmem>>, vector<1x80xf32>
    %114 = vector.shape_cast %113 : vector<1x80xf32> to vector<1x1x80xf32>
    %115 = vector.broadcast %114 : vector<1x1x80xf32> to vector<5x8x80xf32>
    %116 = arith.addf %112, %115 : vector<5x8x80xf32>
    %cst_61 = arith.constant 0.000000e+00 : f32
    %117 = vector.broadcast %cst_61 : f32 to vector<5x8x80xf32>
    %118 = arith.maximumf %116, %117 : vector<5x8x80xf32>
    %119 = vector.extract_strided_slice %118 {offsets = [0, 0, 0], sizes = [1, 8, 80], strides = [1, 1, 1]} : vector<5x8x80xf32> to vector<1x8x80xf32>
    %120 = vector.shape_cast %119 : vector<1x8x80xf32> to vector<8x80xf32>
    %c0_62 = arith.constant 0 : index
    %c0_63 = arith.constant 0 : index
    %c0_64 = arith.constant 0 : index
    %121 = vector.load %arg6[%c0_62, %c0_63, %c0_64] : memref<5x80x120xf32, #tpu.memory_space<vmem>>, vector<1x80x120xf32>
    %122 = vector.shape_cast %121 : vector<1x80x120xf32> to vector<80x120xf32>
    %cst_65 = arith.constant dense<0.000000e+00> : vector<8x120xf32>
    %123 = tpu.matmul %120, %122, %cst_65 {dimension_numbers = #tpu.dot_dimension_numbers<[1], [0], [0], [1], [0, 0, 1, 1], [], []>} : vector<8x80xf32>, vector<80x120xf32>, vector<8x120xf32> -> vector<8x120xf32>
    %124 = vector.extract_strided_slice %118 {offsets = [1, 0, 0], sizes = [1, 8, 80], strides = [1, 1, 1]} : vector<5x8x80xf32> to vector<1x8x80xf32>
    %125 = vector.shape_cast %124 : vector<1x8x80xf32> to vector<8x80xf32>
    %c1_66 = arith.constant 1 : index
    %c0_67 = arith.constant 0 : index
    %c0_68 = arith.constant 0 : index
    %126 = vector.load %arg6[%c1_66, %c0_67, %c0_68] : memref<5x80x120xf32, #tpu.memory_space<vmem>>, vector<1x80x120xf32>
    %127 = vector.shape_cast %126 : vector<1x80x120xf32> to vector<80x120xf32>
    %cst_69 = arith.constant dense<0.000000e+00> : vector<8x120xf32>
    %128 = tpu.matmul %125, %127, %cst_69 {dimension_numbers = #tpu.dot_dimension_numbers<[1], [0], [0], [1], [0, 0, 1, 1], [], []>} : vector<8x80xf32>, vector<80x120xf32>, vector<8x120xf32> -> vector<8x120xf32>
    %129 = arith.addf %123, %128 : vector<8x120xf32>
    %130 = vector.extract_strided_slice %118 {offsets = [2, 0, 0], sizes = [1, 8, 80], strides = [1, 1, 1]} : vector<5x8x80xf32> to vector<1x8x80xf32>
    %131 = vector.shape_cast %130 : vector<1x8x80xf32> to vector<8x80xf32>
    %c2_70 = arith.constant 2 : index
    %c0_71 = arith.constant 0 : index
    %c0_72 = arith.constant 0 : index
    %132 = vector.load %arg6[%c2_70, %c0_71, %c0_72] : memref<5x80x120xf32, #tpu.memory_space<vmem>>, vector<1x80x120xf32>
    %133 = vector.shape_cast %132 : vector<1x80x120xf32> to vector<80x120xf32>
    %cst_73 = arith.constant dense<0.000000e+00> : vector<8x120xf32>
    %134 = tpu.matmul %131, %133, %cst_73 {dimension_numbers = #tpu.dot_dimension_numbers<[1], [0], [0], [1], [0, 0, 1, 1], [], []>} : vector<8x80xf32>, vector<80x120xf32>, vector<8x120xf32> -> vector<8x120xf32>
    %135 = arith.addf %129, %134 : vector<8x120xf32>
    %136 = vector.extract_strided_slice %118 {offsets = [3, 0, 0], sizes = [1, 8, 80], strides = [1, 1, 1]} : vector<5x8x80xf32> to vector<1x8x80xf32>
    %137 = vector.shape_cast %136 : vector<1x8x80xf32> to vector<8x80xf32>
    %c3_74 = arith.constant 3 : index
    %c0_75 = arith.constant 0 : index
    %c0_76 = arith.constant 0 : index
    %138 = vector.load %arg6[%c3_74, %c0_75, %c0_76] : memref<5x80x120xf32, #tpu.memory_space<vmem>>, vector<1x80x120xf32>
    %139 = vector.shape_cast %138 : vector<1x80x120xf32> to vector<80x120xf32>
    %cst_77 = arith.constant dense<0.000000e+00> : vector<8x120xf32>
    %140 = tpu.matmul %137, %139, %cst_77 {dimension_numbers = #tpu.dot_dimension_numbers<[1], [0], [0], [1], [0, 0, 1, 1], [], []>} : vector<8x80xf32>, vector<80x120xf32>, vector<8x120xf32> -> vector<8x120xf32>
    %141 = arith.addf %135, %140 : vector<8x120xf32>
    %142 = vector.extract_strided_slice %118 {offsets = [4, 0, 0], sizes = [1, 8, 80], strides = [1, 1, 1]} : vector<5x8x80xf32> to vector<1x8x80xf32>
    %143 = vector.shape_cast %142 : vector<1x8x80xf32> to vector<8x80xf32>
    %c4_78 = arith.constant 4 : index
    %c0_79 = arith.constant 0 : index
    %c0_80 = arith.constant 0 : index
    %144 = vector.load %arg6[%c4_78, %c0_79, %c0_80] : memref<5x80x120xf32, #tpu.memory_space<vmem>>, vector<1x80x120xf32>
    %145 = vector.shape_cast %144 : vector<1x80x120xf32> to vector<80x120xf32>
    %cst_81 = arith.constant dense<0.000000e+00> : vector<8x120xf32>
    %146 = tpu.matmul %143, %145, %cst_81 {dimension_numbers = #tpu.dot_dimension_numbers<[1], [0], [0], [1], [0, 0, 1, 1], [], []>} : vector<8x80xf32>, vector<80x120xf32>, vector<8x120xf32> -> vector<8x120xf32>
    %147 = arith.addf %141, %146 : vector<8x120xf32>
    %c0_82 = arith.constant 0 : index
    %c0_83 = arith.constant 0 : index
    %148 = vector.load %arg7[%c0_82, %c0_83] : memref<1x120xf32, #tpu.memory_space<vmem>>, vector<1x120xf32>
    %149 = vector.broadcast %148 : vector<1x120xf32> to vector<8x120xf32>
    %150 = arith.addf %147, %149 : vector<8x120xf32>
    %c0_84 = arith.constant 0 : index
    %c0_85 = arith.constant 0 : index
    %151 = vector.load %arg8[%c0_84, %c0_85] : memref<120x84xf32, #tpu.memory_space<vmem>>, vector<120x84xf32>
    %cst_86 = arith.constant dense<0.000000e+00> : vector<8x84xf32>
    %152 = tpu.matmul %150, %151, %cst_86 {dimension_numbers = #tpu.dot_dimension_numbers<[1], [0], [0], [1], [0, 0, 1, 1], [], []>} : vector<8x120xf32>, vector<120x84xf32>, vector<8x84xf32> -> vector<8x84xf32>
    %c0_87 = arith.constant 0 : index
    %c0_88 = arith.constant 0 : index
    %153 = vector.load %arg9[%c0_87, %c0_88] : memref<1x84xf32, #tpu.memory_space<vmem>>, vector<1x84xf32>
    %154 = vector.broadcast %153 : vector<1x84xf32> to vector<8x84xf32>
    %155 = arith.addf %152, %154 : vector<8x84xf32>
    %c0_89 = arith.constant 0 : index
    %c0_90 = arith.constant 0 : index
    %156 = vector.load %arg10[%c0_89, %c0_90] : memref<84x128xf32, #tpu.memory_space<vmem>>, vector<84x128xf32>
    %cst_91 = arith.constant dense<0.000000e+00> : vector<8x128xf32>
    %157 = tpu.matmul %155, %156, %cst_91 {dimension_numbers = #tpu.dot_dimension_numbers<[1], [0], [0], [1], [0, 0, 1, 1], [], []>} : vector<8x84xf32>, vector<84x128xf32>, vector<8x128xf32> -> vector<8x128xf32>
    %c0_92 = arith.constant 0 : index
    %c0_93 = arith.constant 0 : index
    %158 = vector.load %arg11[%c0_92, %c0_93] : memref<1x128xf32, #tpu.memory_space<vmem>>, vector<1x128xf32>
    %159 = vector.broadcast %158 : vector<1x128xf32> to vector<8x128xf32>
    %160 = arith.addf %157, %159 : vector<8x128xf32>
    %c0_94 = arith.constant 0 : index
    %c0_95 = arith.constant 0 : index
    %161 = vector.load %arg12[%c0_94, %c0_95] : memref<8x128xf32, #tpu.memory_space<vmem>>, vector<8x128xf32>
    tpu.vector_store %arg12[%c0_94, %c0_95], %160 {strides = array<i32>} : memref<8x128xf32, #tpu.memory_space<vmem>>, vector<8x128xf32>,
    return
  }
  func.func @transform_0(%arg0: i32) -> (i32, i32, i32) {
    %c0_i32 = arith.constant 0 : i32
    %c0_i32_0 = arith.constant 0 : i32
    %c0_i32_1 = arith.constant 0 : i32
    return %c0_i32, %arg0, %c0_i32_0 : i32, i32, i32
  }
  func.func @transform_1(%arg0: i32) -> (i32, i32, i32) {
    %c0_i32 = arith.constant 0 : i32
    %c0_i32_0 = arith.constant 0 : i32
    %c0_i32_1 = arith.constant 0 : i32
    %c0_i32_2 = arith.constant 0 : i32
    return %c0_i32, %c0_i32_0, %c0_i32_1 : i32, i32, i32
  }
  func.func @transform_2(%arg0: i32) -> (i32, i32) {
    %c0_i32 = arith.constant 0 : i32
    %c0_i32_0 = arith.constant 0 : i32
    %c0_i32_1 = arith.constant 0 : i32
    return %c0_i32, %c0_i32_0 : i32, i32
  }
  func.func @transform_3(%arg0: i32) -> (i32, i32, i32) {
    %c0_i32 = arith.constant 0 : i32
    %c0_i32_0 = arith.constant 0 : i32
    %c0_i32_1 = arith.constant 0 : i32
    %c0_i32_2 = arith.constant 0 : i32
    return %c0_i32, %c0_i32_0, %c0_i32_1 : i32, i32, i32
  }
  func.func @transform_4(%arg0: i32) -> (i32, i32) {
    %c0_i32 = arith.constant 0 : i32
    %c0_i32_0 = arith.constant 0 : i32
    %c0_i32_1 = arith.constant 0 : i32
    return %c0_i32, %c0_i32_0 : i32, i32
  }
  func.func @transform_5(%arg0: i32) -> (i32, i32, i32) {
    %c0_i32 = arith.constant 0 : i32
    %c0_i32_0 = arith.constant 0 : i32
    %c0_i32_1 = arith.constant 0 : i32
    %c0_i32_2 = arith.constant 0 : i32
    return %c0_i32, %c0_i32_0, %c0_i32_1 : i32, i32, i32
  }
  func.func @transform_6(%arg0: i32) -> (i32, i32) {
    %c0_i32 = arith.constant 0 : i32
    %c0_i32_0 = arith.constant 0 : i32
    %c0_i32_1 = arith.constant 0 : i32
    return %c0_i32, %c0_i32_0 : i32, i32
  }
  func.func @transform_7(%arg0: i32) -> (i32, i32) {
    %c0_i32 = arith.constant 0 : i32
    %c0_i32_0 = arith.constant 0 : i32
    %c0_i32_1 = arith.constant 0 : i32
    return %c0_i32, %c0_i32_0 : i32, i32
  }
  func.func @transform_8(%arg0: i32) -> (i32, i32) {
    %c0_i32 = arith.constant 0 : i32
    %c0_i32_0 = arith.constant 0 : i32
    %c0_i32_1 = arith.constant 0 : i32
    return %c0_i32, %c0_i32_0 : i32, i32
  }
  func.func @transform_9(%arg0: i32) -> (i32, i32) {
    %c0_i32 = arith.constant 0 : i32
    %c0_i32_0 = arith.constant 0 : i32
    %c0_i32_1 = arith.constant 0 : i32
    return %c0_i32, %c0_i32_0 : i32, i32
  }
  func.func @transform_10(%arg0: i32) -> (i32, i32) {
    %c0_i32 = arith.constant 0 : i32
    %c0_i32_0 = arith.constant 0 : i32
    %c0_i32_1 = arith.constant 0 : i32
    return %c0_i32, %c0_i32_0 : i32, i32
  }
  func.func @transform_11(%arg0: i32) -> (i32, i32) {
    %c0_i32 = arith.constant 0 : i32
    %c0_i32_0 = arith.constant 0 : i32
    return %arg0, %c0_i32 : i32, i32
  }
}

</mosaic_0001>

<bundles_post_ra>
// kernel: cnn_forward.1
= control target key start
LH: loop header
LB: loop body
LE: loop exit
PB: predicated region body
PF: predicated region fallthrough
CT: control target
= control target key end

     0   :  { %vm162_vm0 = vcmask 1045504   ;;  %vm77_vm1 = vcmask 244736   ;;  %vm997_vm2 = vcmask 1043456   ;;  %vm966_vm3 = vcmask 687104   ;;  %s4298_s1 = inlined_call_operand.vmem [shape: f32[6,30,84], index: 1, kind: input, shape index: {}]   ;;  %s4299_s0 = inlined_call_operand.vmem [shape: f32[30,8,30], index: 0, kind: input, shape index: {}]   ;;  %s4300_s3 = inlined_call_operand.vmem [shape: f32[10,84,80], index: 3, kind: input, shape index: {}]   ;;  %s4301_s2 = inlined_call_operand.vmem [shape: f32[1,84], index: 2, kind: input, shape index: {}]   ;;  %s4302_s4 = inlined_call_operand.vmem [shape: f32[1,80], index: 4, kind: input, shape index: {}]   ;;  %s4303_s5 = inlined_call_operand.vmem [shape: f32[5,80,120], index: 5, kind: input, shape index: {}]   ;;  %s4304_s6 = inlined_call_operand.vmem [shape: f32[1,120], index: 6, kind: input, shape index: {}]   ;;  %s4305_s8 = inlined_call_operand.vmem [shape: f32[1,84], index: 8, kind: input, shape index: {}]   ;;  %s4306_s7 = inlined_call_operand.vmem [shape: f32[120,84], index: 7, kind: input, shape index: {}]   ;;  %s4307_s9 = inlined_call_operand.vmem [shape: f32[84,128], index: 9, kind: input, shape index: {}]   ;;  %s4308_s10 = inlined_call_operand.vmem [shape: f32[1,128], index: 10, kind: input, shape index: {}]   ;;  %s4309_s11 = inlined_call_operand.vmem [shape: f32[8,128], index: 11, kind: output, shape index: {}]  }
   0x1   :  { %v1965_v0 = vld [vmem:[%s4298_s1 + $0x38] sm:$0x3f]  ;;  %v1964_v3 = vld [vmem:[%s4298_s1 + $0x30] sm:$0xff]  ;;  %v1963_v6 = vld [vmem:[%s4298_s1 + $0x28] sm:$0xff]  ;;  %vm1716_vm4 = vcmask 654336   ;;  %vm1892_vm5 = vcmask 982016  }
   0x2   :  { %v71_v1 = vld [vmem:[%s4298_s1 + $0x18] sm:$0x3f]  ;;  %1966 = vmatpush.msk.msra.mxu0 %vm162_vm0, %v1965_v0  ;;  %v70_v4 = vld [vmem:[%s4298_s1 + $0x10] sm:$0xff]  ;;  %v69_v7 = vld [vmem:[%s4298_s1 + $0x8] sm:$0xff] }
   0x3   :  { %v2027_v2 = vld [vmem:[%s4298_s1 + $0x58] sm:$0x3f]  ;;  %1995 = vmatpush.msk.msra.mxu1 %vm162_vm0, %v71_v1  ;;  %v2026_v5 = vld [vmem:[%s4298_s1 + $0x50] sm:$0xff]  ;;  %v2025_v8 = vld [vmem:[%s4298_s1 + $0x48] sm:$0xff] }
   0x4   :  { %2028 = vmatpush.msk.msra.mxu2 %vm162_vm0, %v2027_v2  ;;  %2413 = vmatpush.msk.msra.mxu3 %vm162_vm0, %v2027_v2  ;;  %v1962_v9 = vld [vmem:[%s4298_s1 + $0x20] sm:$0xff]  ;;  %v2526_v12 = vld [vmem:[%s4299_s0 + $0x8] sm:$0xff]  ;;  %v2536_v14 = vld [vmem:[%s4299_s0 + $0x10] sm:$0xff] }
   0x5   :  { %179 = vmatpush.msra.mxu0 %v1964_v3  ;;  %286 = vmatpush.msra.mxu1 %v70_v4  ;;  %v68_v10 = vld [vmem:[%s4298_s1] sm:$0xff]  ;;  %v2060_v15 = vld [vmem:[%s4298_s1 + $0x78] sm:$0x3f]  ;;  %v2577_v19 = vld [vmem:[%s4299_s0 + $0x28] sm:$0xff] }
   0x6   :  { %398 = vmatpush.msra.mxu2 %v2026_v5  ;;  %2414 = vmatpush.msra.mxu3 %v2026_v5  ;;  %v2024_v11 = vld [vmem:[%s4298_s1 + $0x40] sm:$0xff]  ;;  %v2126_v16 = vld [vmem:[%s4298_s1 + $0xb8] sm:$0x3f]  ;;  %v2059_v20 = vld [vmem:[%s4298_s1 + $0x70] sm:$0xff] }
   0x7   :  { %180 = vmatpush.msra.mxu0 %v1963_v6  ;;  %287 = vmatpush.msra.mxu1 %v69_v7  ;;  %v2531_v13 = vld [vmem:[%s4299_s0] sm:$0xff]  ;;  %v2555_v17 = vld [vmem:[%s4299_s0 + $0x18] sm:$0xff]  ;;  %v2125_v21 = vld [vmem:[%s4298_s1 + $0xb0] sm:$0xff] }
   0x8   :  { %399 = vmatpush.msra.mxu2 %v2025_v8  ;;  %2415 = vmatpush.msra.mxu3 %v2025_v8  ;;  %v2566_v18 = vld [vmem:[%s4299_s0 + $0x20] sm:$0xff]  ;;  %v2594_v22 = vld [vmem:[%s4299_s0 + $0x30] sm:$0xff]  ;;  %v2605_v23 = vld [vmem:[%s4299_s0 + $0x38] sm:$0xff] }
   0x9   :  { %181 = vmatpush.msra.mxu0 %v1962_v9  ;;  %288 = vmatpush.msra.mxu1 %v68_v10  ;;  %v2616_v24 = vld [vmem:[%s4299_s0 + $0x40] sm:$0xff]  ;;  %v2627_v25 = vld [vmem:[%s4299_s0 + $0x48] sm:$0xff]  ;;  %v2638_v26 = vld [vmem:[%s4299_s0 + $0x50] sm:$0xff] }
   0xa   :  { %400 = vmatpush.msra.mxu2 %v2024_v11  ;;  %1967 = vmatmul.msk.f32.vlgmr.msra.gmra.mxu0 %vm77_vm1, %v2526_v12  ;;  %v2649_v27 = vld [vmem:[%s4299_s0 + $0x58] sm:$0xff]  ;;  %v2660_v28 = vld [vmem:[%s4299_s0 + $0x60] sm:$0xff]  ;;  %v2058_v29 = vld [vmem:[%s4298_s1 + $0x68] sm:$0xff] }
   0xb   :  { %1996 = vmatmul.msk.f32.vlgmr.msra.gmra.mxu1 %vm77_vm1, %v2531_v13  ;;  %2029 = vmatmul.msk.f32.vlgmr.msra.gmra.mxu2 %vm77_vm1, %v2536_v14  ;;  %v2124_v30 = vld [vmem:[%s4298_s1 + $0xa8] sm:$0xff]  ;;  %v2688_v32 = vld [vmem:[%s4299_s0 + $0x70] sm:$0xff]  ;;  %v2699_v33 = vld [vmem:[%s4299_s0 + $0x78] sm:$0xff] }
   0xc   :  { %2094 = vmatpush.msk.msrb.mxu0 %vm162_vm0, %v2060_v15  ;;  %2127 = vmatpush.msk.msrb.mxu1 %vm162_vm0, %v2126_v16  ;;  %v2677_v31 = vld [vmem:[%s4299_s0 + $0x68] sm:$0xff]  ;;  %v2064_v35 = vld [vmem:[%s4298_s1 + $0x98] sm:$0x3f]  ;;  %v2063_v36 = vld [vmem:[%s4298_s1 + $0x90] sm:$0xff] }
   0xd   :  { %2416 = vmatpush.msra.mxu3 %v2024_v11  ;;  %v2710_v34 = vld [vmem:[%s4299_s0 + $0xe8] sm:$0xff]  ;;  %v2724_v37 = vld [vmem:[%s4299_s0 + $0x80] sm:$0xff]  ;;  %v2760_v43 = vld [vmem:[%s4299_s0 + $0x90] sm:$0xff] }
   0xe   :  { %644 = vmatpush.msrb.mxu0 %v2059_v20  ;;  %753 = vmatpush.msrb.mxu1 %v2125_v21  ;;  %v2062_v38 = vld [vmem:[%s4298_s1 + $0x88] sm:$0xff]  ;;  %v2061_v39 = vld [vmem:[%s4298_s1 + $0x80] sm:$0xff]  ;;  %v2777_v46 = vld [vmem:[%s4299_s0 + $0x98] sm:$0xff] }
   0xf   :  { %2056 = vmatmul.msk.f32.vlgmr.msra.gmra.mxu3 %vm77_vm1, %v2710_v34  ;;  %v2743_v40 = vld [vmem:[%s4299_s0 + $0x88] sm:$0xff]  ;;  %v2057_v47 = vld [vmem:[%s4298_s1 + $0x60] sm:$0xff]  ;;  %v2834_v57 = vld [vmem:[%s4299_s0 + $0xb0] sm:$0xff] }
  0x10   :  { %645 = vmatpush.msrb.mxu0 %v2058_v29  ;;  %754 = vmatpush.msrb.mxu1 %v2124_v30  ;;  %v2123_v48 = vld [vmem:[%s4298_s1 + $0xa0] sm:$0xff]  ;;  %v2817_v54 = vld [vmem:[%s4299_s0 + $0xa8] sm:$0xff]  ;;  %v2851_v60 = vld [vmem:[%s4299_s0 + $0xb8] sm:$0xff] }
  0x11   :  { %2065 = vmatpush.msk.msrb.mxu3 %vm162_vm0, %v2064_v35  ;;  %v2800_v51 = vld [vmem:[%s4299_s0 + $0xa0] sm:$0xff]  ;;  %v2885_v2 = vld [vmem:[%s4299_s0 + $0xc8] sm:$0xff]  ;;  %v2904_v6 = vld [vmem:[%s4299_s0 + $0xd0] sm:$0xff] }
  0x12   :  { %1968 = vmatmul.msk.f32.gmra.mxu0 %vm77_vm1, %v2536_v14  ;;  %755 = vmatpush.msrb.mxu1 %v2123_v48  ;;  %v2868_v63 = vld [vmem:[%s4299_s0 + $0xc0] sm:$0xff]  ;;  %v2921_v9 = vld [vmem:[%s4299_s0 + $0xd8] sm:$0xff]  ;;  %v953_v15 = vld [vmem:[%s4300_s3 + $0x50] sm:$0xf] }
  0x13   :  { %1997 = vmatmul.msk.f32.gmra.mxu1 %vm77_vm1, %v2526_v12  ;;  %2030 = vmatmul.msk.f32.gmra.mxu2 %vm77_vm1, %v2555_v17  ;;  %v2943_v20 = vld [vmem:[%s4299_s0 + $0xe0] sm:$0xff]  ;;  %v2166_v29 = vld [vmem:[%s4300_s3 + $0xa8] sm:$0xf] }
  0x14   :  { %540 = vmatpush.msrb.mxu3 %v2063_v36  ;;  %646 = vmatpush.msrb.mxu0 %v2057_v47 }
  0x15   :  { %2167 = vmatpush.msk.msrb.mxu2 %vm997_vm2, %v2166_v29 }
  0x16   :  { %541 = vmatpush.msrb.mxu3 %v2062_v38 }
  0x18   :  { %542 = vmatpush.msrb.mxu3 %v2061_v39  ;;  %v952_v39 = vld [vmem:[%s4300_s3 + $0x48] sm:$0xff] }
  0x19   :  { %2066 = vmatmul.msk.f32.vlgmr.msrb.gmra.mxu3 %vm77_vm1, %v2526_v12 }
  0x1a   :  { %1969 = vmatmul.msk.f32.gmra.mxu0 %vm77_vm1, %v2555_v17  ;;  %2178 = vmatpush.msk.msra.mxu3 %vm997_vm2, %v953_v15  ;;  %v2165_v15 = vld [vmem:[%s4300_s3 + $0xa0] sm:$0xff] }
  0x1b   :  { %1998 = vmatmul.msk.f32.gmra.mxu1 %vm77_vm1, %v2536_v14  ;;  %2031 = vmatmul.msk.f32.gmra.mxu2 %vm77_vm1, %v2566_v18 }
  0x1c   :  { %1060 = vmatpush.msra.mxu3 %v952_v39  ;;  %1007 = vmatpush.msrb.mxu2 %v2165_v15  ;;  %v951_v15 = vld [vmem:[%s4300_s3 + $0x40] sm:$0xff] }
  0x1e   :  { %1061 = vmatpush.msra.mxu3 %v951_v15 }
  0x21   :  { %2067 = vmatmul.msk.f32.gmra.mxu3 %vm77_vm1, %v2536_v14 }
  0x22   :  { %1970 = vmatmul.msk.f32.gmra.mxu0 %vm77_vm1, %v2566_v18 }
  0x23   :  { %1999 = vmatmul.msk.f32.gmra.mxu1 %vm77_vm1, %v2555_v17  ;;  %2032 = vmatmul.msk.f32.gmra.mxu2 %vm77_vm1, %v2577_v19 }
  0x29   :  { %2068 = vmatmul.msk.f32.gmra.mxu3 %vm77_vm1, %v2555_v17 }
  0x2a   :  { %1971 = vmatmul.msk.f32.gmra.mxu0 %vm77_vm1, %v2577_v19 }
  0x2b   :  { %2000 = vmatmul.msk.f32.gmra.mxu1 %vm77_vm1, %v2566_v18  ;;  %2033 = vmatmul.msk.f32.gmra.mxu2 %vm77_vm1, %v2594_v22 }
  0x31   :  { %2069 = vmatmul.msk.f32.gmra.mxu3 %vm77_vm1, %v2566_v18 }
  0x32   :  { %1972 = vmatmul.msk.f32.gmra.mxu0 %vm77_vm1, %v2594_v22 }
  0x33   :  { %2001 = vmatmul.msk.f32.gmra.mxu1 %vm77_vm1, %v2577_v19  ;;  %2034 = vmatmul.msk.f32.gmra.mxu2 %vm77_vm1, %v2605_v23 }
  0x39   :  { %2070 = vmatmul.msk.f32.gmra.mxu3 %vm77_vm1, %v2577_v19 }
  0x3a   :  { %1973 = vmatmul.msk.f32.gmra.mxu0 %vm77_vm1, %v2605_v23 }
  0x3b   :  { %2002 = vmatmul.msk.f32.gmra.mxu1 %vm77_vm1, %v2594_v22  ;;  %2035 = vmatmul.msk.f32.gmra.mxu2 %vm77_vm1, %v2616_v24 }
  0x41   :  { %2071 = vmatmul.msk.f32.gmra.mxu3 %vm77_vm1, %v2594_v22 }
  0x42   :  { %1974 = vmatmul.msk.f32.gmra.mxu0 %vm77_vm1, %v2616_v24 }
  0x43   :  { %2003 = vmatmul.msk.f32.gmra.mxu1 %vm77_vm1, %v2605_v23  ;;  %2036 = vmatmul.msk.f32.gmra.mxu2 %vm77_vm1, %v2627_v25 }
  0x49   :  { %2072 = vmatmul.msk.f32.gmra.mxu3 %vm77_vm1, %v2605_v23 }
  0x4a   :  { %1975 = vmatmul.msk.f32.gmra.mxu0 %vm77_vm1, %v2627_v25 }
  0x4b   :  { %2004 = vmatmul.msk.f32.gmra.mxu1 %vm77_vm1, %v2616_v24  ;;  %2037 = vmatmul.msk.f32.gmra.mxu2 %vm77_vm1, %v2638_v26 }
  0x51   :  { %2073 = vmatmul.msk.f32.gmra.mxu3 %vm77_vm1, %v2616_v24 }
  0x52   :  { %1976 = vmatmul.msk.f32.gmra.mxu0 %vm77_vm1, %v2638_v26 }
  0x53   :  { %2005 = vmatmul.msk.f32.gmra.mxu1 %vm77_vm1, %v2627_v25  ;;  %2038 = vmatmul.msk.f32.gmra.mxu2 %vm77_vm1, %v2649_v27 }
  0x59   :  { %2074 = vmatmul.msk.f32.gmra.mxu3 %vm77_vm1, %v2627_v25 }
  0x5a   :  { %1977 = vmatmul.msk.f32.gmra.mxu0 %vm77_vm1, %v2649_v27 }
  0x5b   :  { %2006 = vmatmul.msk.f32.gmra.mxu1 %vm77_vm1, %v2638_v26  ;;  %2039 = vmatmul.msk.f32.gmra.mxu2 %vm77_vm1, %v2660_v28 }
  0x61   :  { %2075 = vmatmul.msk.f32.gmra.mxu3 %vm77_vm1, %v2638_v26 }
  0x62   :  { %1978 = vmatmul.msk.f32.gmra.mxu0 %vm77_vm1, %v2660_v28 }
  0x63   :  { %2007 = vmatmul.msk.f32.gmra.mxu1 %vm77_vm1, %v2649_v27  ;;  %2040 = vmatmul.msk.f32.gmra.mxu2 %vm77_vm1, %v2677_v31 }
  0x69   :  { %2076 = vmatmul.msk.f32.gmra.mxu3 %vm77_vm1, %v2649_v27 }
  0x6a   :  { %1979 = vmatmul.msk.f32.gmra.mxu0 %vm77_vm1, %v2677_v31 }
  0x6b   :  { %2008 = vmatmul.msk.f32.gmra.mxu1 %vm77_vm1, %v2660_v28  ;;  %2041 = vmatmul.msk.f32.gmra.mxu2 %vm77_vm1, %v2688_v32 }
  0x71   :  { %2077 = vmatmul.msk.f32.gmra.mxu3 %vm77_vm1, %v2660_v28 }
  0x72   :  { %1980 = vmatmul.msk.f32.gmra.mxu0 %vm77_vm1, %v2688_v32 }
  0x73   :  { %2009 = vmatmul.msk.f32.gmra.mxu1 %vm77_vm1, %v2677_v31  ;;  %2042 = vmatmul.msk.f32.gmra.mxu2 %vm77_vm1, %v2699_v33 }
  0x79   :  { %2078 = vmatmul.msk.f32.gmra.mxu3 %vm77_vm1, %v2677_v31 }
  0x7a   :  { %1981 = vmatmul.msk.f32.gmra.mxu0 %vm77_vm1, %v2699_v33 }
  0x7b   :  { %2010 = vmatmul.msk.f32.gmra.mxu1 %vm77_vm1, %v2688_v32  ;;  %2043 = vmatmul.msk.f32.gmra.mxu2 %vm77_vm1, %v2724_v37 }
  0x81   :  { %2079 = vmatmul.msk.f32.gmra.mxu3 %vm77_vm1, %v2688_v32 }
  0x82   :  { %1982 = vmatmul.msk.f32.gmra.mxu0 %vm77_vm1, %v2724_v37 }
  0x83   :  { %2011 = vmatmul.msk.f32.gmra.mxu1 %vm77_vm1, %v2699_v33  ;;  %2044 = vmatmul.msk.f32.gmra.mxu2 %vm77_vm1, %v2743_v40 }
  0x87   :  { %v2753_v41 = vpop.f32.mrf.mxu0 }
  0x88   :  { %v2755_v42 = vpop.f32.mrf.mxu1 }
  0x89   :  { %2080 = vmatmul.msk.f32.gmra.mxu3 %vm77_vm1, %v2699_v33 }
  0x8a   :  { %1983 = vmatmul.msk.f32.gmra.mxu0 %vm77_vm1, %v2743_v40 }
  0x8b   :  { %2012 = vmatmul.msk.f32.gmra.mxu1 %vm77_vm1, %v2724_v37  ;;  %2045 = vmatmul.msk.f32.gmra.mxu2 %vm77_vm1, %v2760_v43 }
  0x8e   :  { %v2895_v3 = vpop.f32.mrf.mxu2 }
  0x8f   :  { %v2770_v44 = vpop.f32.mrf.mxu0 }
  0x90   :  { %v2772_v45 = vpop.f32.mrf.mxu1 }
  0x91   :  { %2081 = vmatmul.msk.f32.gmra.mxu3 %vm77_vm1, %v2724_v37 }
  0x92   :  { %1984 = vmatmul.msk.f32.gmra.mxu0 %vm77_vm1, %v2760_v43 }
  0x93   :  { %2013 = vmatmul.msk.f32.gmra.mxu1 %vm77_vm1, %v2743_v40  ;;  %2046 = vmatmul.msk.f32.gmra.mxu2 %vm77_vm1, %v2777_v46 }
  0x96   :  { %v2923_v10 = vpop.f32.mrf.mxu2 }
  0x97   :  { %v2793_v49 = vpop.f32.mrf.mxu0 }
  0x98   :  { %v2795_v50 = vpop.f32.mrf.mxu1 }
  0x99   :  { %2082 = vmatmul.msk.f32.gmra.mxu3 %vm77_vm1, %v2743_v40 }
  0x9a   :  { %1985 = vmatmul.msk.f32.gmra.mxu0 %vm77_vm1, %v2777_v46 }
  0x9b   :  { %2014 = vmatmul.msk.f32.gmra.mxu1 %vm77_vm1, %v2760_v43  ;;  %2047 = vmatmul.msk.f32.gmra.mxu2 %vm77_vm1, %v2800_v51 }
  0x9e   :  { %v2948_v21 = vpop.f32.mrf.mxu2 }
  0x9f   :  { %v2810_v52 = vpop.f32.mrf.mxu0 }
  0xa0   :  { %v2812_v53 = vpop.f32.mrf.mxu1 }
  0xa1   :  { %2083 = vmatmul.msk.f32.gmra.mxu3 %vm77_vm1, %v2760_v43 }
  0xa2   :  { %1986 = vmatmul.msk.f32.gmra.mxu0 %vm77_vm1, %v2800_v51 }
  0xa3   :  { %2015 = vmatmul.msk.f32.gmra.mxu1 %vm77_vm1, %v2777_v46  ;;  %2048 = vmatmul.msk.f32.gmra.mxu2 %vm77_vm1, %v2817_v54 }
  0xa7   :  { %v2827_v55 = vpop.f32.mrf.mxu0 }
  0xa8   :  { %v2829_v56 = vpop.f32.mrf.mxu1 }
  0xa9   :  { %2084 = vmatmul.msk.f32.gmra.mxu3 %vm77_vm1, %v2777_v46 }
  0xaa   :  { %1987 = vmatmul.msk.f32.gmra.mxu0 %vm77_vm1, %v2817_v54 }
  0xab   :  { %2016 = vmatmul.msk.f32.gmra.mxu1 %vm77_vm1, %v2800_v51  ;;  %2049 = vmatmul.msk.f32.gmra.mxu2 %vm77_vm1, %v2834_v57 }
  0xaf   :  { %v2844_v58 = vpop.f32.mrf.mxu0 }
  0xb0   :  { %v2846_v59 = vpop.f32.mrf.mxu1 }
  0xb1   :  { %2085 = vmatmul.msk.f32.gmra.mxu3 %vm77_vm1, %v2800_v51 }
  0xb2   :  { %1988 = vmatmul.msk.f32.gmra.mxu0 %vm77_vm1, %v2834_v57 }
  0xb3   :  { %2017 = vmatmul.msk.f32.gmra.mxu1 %vm77_vm1, %v2817_v54  ;;  %2050 = vmatmul.msk.f32.gmra.mxu2 %vm77_vm1, %v2851_v60 }
  0xb7   :  { %v2861_v61 = vpop.f32.mrf.mxu0 }
  0xb8   :  { %v2863_v62 = vpop.f32.mrf.mxu1 }
  0xb9   :  { %2086 = vmatmul.msk.f32.gmra.mxu3 %vm77_vm1, %v2817_v54 }
  0xba   :  { %1989 = vmatmul.msk.f32.gmra.mxu0 %vm77_vm1, %v2851_v60 }
  0xbb   :  { %2018 = vmatmul.msk.f32.gmra.mxu1 %vm77_vm1, %v2834_v57  ;;  %2051 = vmatmul.msk.f32.gmra.mxu2 %vm77_vm1, %v2868_v63 }
  0xbf   :  { %v2878_v0 = vpop.f32.mrf.mxu0 }
  0xc0   :  { %v2880_v1 = vpop.f32.mrf.mxu1 }
  0xc1   :  { %2087 = vmatmul.msk.f32.gmra.mxu3 %vm77_vm1, %v2834_v57 }
  0xc2   :  { %1990 = vmatmul.msk.f32.gmra.mxu0 %vm77_vm1, %v2868_v63 }
  0xc3   :  { %2019 = vmatmul.msk.f32.gmra.mxu1 %vm77_vm1, %v2851_v60  ;;  %2052 = vmatmul.msk.f32.gmra.mxu2 %vm77_vm1, %v2885_v2 }
  0xc7   :  { %v2897_v4 = vpop.f32.mrf.mxu0 }
  0xc8   :  { %v2899_v5 = vpop.f32.mrf.mxu1 }
  0xc9   :  { %2088 = vmatmul.msk.f32.gmra.mxu3 %vm77_vm1, %v2851_v60 }
  0xca   :  { %1991 = vmatmul.msk.f32.gmra.mxu0 %vm77_vm1, %v2885_v2 }
  0xcb   :  { %2020 = vmatmul.msk.f32.gmra.mxu1 %vm77_vm1, %v2868_v63  ;;  %2053 = vmatmul.msk.f32.gmra.mxu2 %vm77_vm1, %v2904_v6 }
  0xcf   :  { %v2914_v7 = vpop.f32.mrf.mxu0 }
  0xd0   :  { %v2916_v8 = vpop.f32.mrf.mxu1 }
  0xd2   :  { %1992 = vmatmul.msk.f32.gmra.mxu0 %vm77_vm1, %v2904_v6 }
  0xd3   :  { %2021 = vmatmul.msk.f32.gmra.mxu1 %vm77_vm1, %v2885_v2  ;;  %2054 = vmatmul.msk.f32.gmra.mxu2 %vm77_vm1, %v2921_v9 }
  0xd7   :  { %v2933_v11 = vpop.f32.mrf.mxu0 }
  0xd8   :  { %v2938_v16 = vpop.f32.mrf.mxu1 }
  0xda   :  { %1993 = vmatmul.msk.f32.gmra.mxu0 %vm77_vm1, %v2921_v9 }
  0xdb   :  { %2022 = vmatmul.msk.f32.gmra.mxu1 %vm77_vm1, %v2904_v6  ;;  %2055 = vmatmul.msk.f32.gmra.mxu2 %vm77_vm1, %v2943_v20 }
  0xdf   :  { %v2960_v30 = vpop.f32.mrf.mxu0 }
  0xe0   :  { %v2962_v35 = vpop.f32.mrf.mxu1 }
  0xe2   :  { %1994 = vmatmul.msk.f32.gmra.mxu0 %vm77_vm1, %v2943_v20 }
  0xe3   :  { %2023 = vmatmul.msk.f32.gmra.mxu1 %vm77_vm1, %v2921_v9 }
  0xe7   :  { %v2970_v36 = vpop.f32.mrf.mxu0 }
  0xe8   :  { %v2972_v38 = vpop.f32.mrf.mxu1 }
  0xe9   :  { %4310 = vst [vmem:[#allocation2_spill] sm:$0xff] %v2972_v38 }
  0xea   :  { %2095 = vmatmul.msk.f32.vlgmr.msrb.gmra.mxu0 %vm77_vm1, %v2531_v13 }
  0xeb   :  { %2128 = vmatmul.msk.f32.vlgmr.msrb.gmra.mxu1 %vm77_vm1, %v2536_v14 }
  0xef   :  { %v2983_v47 = vpop.f32.mrf.mxu0 }
  0xf0   :  { %4311 = vst [vmem:[#allocation3_spill] sm:$0xff] %v2983_v47  ;;  %v2985_v48 = vpop.f32.mrf.mxu1 }
  0xf1   :  { %4312 = vst [vmem:[#allocation4_spill] sm:$0xff] %v2985_v48 }
  0xf2   :  { %2096 = vmatmul.msk.f32.gmra.mxu0 %vm77_vm1, %v2526_v12 }
  0xf3   :  { %2129 = vmatmul.msk.f32.gmra.mxu1 %vm77_vm1, %v2555_v17 }
  0xf7   :  { %v2996_v13 = vpop.f32.mrf.mxu0 }
  0xf8   :  { %4313 = vst [vmem:[#allocation5_spill] sm:$0xff] %v2996_v13  ;;  %v2998_v29 = vpop.f32.mrf.mxu1 }
  0xf9   :  { %4314 = vst [vmem:[#allocation6_spill] sm:$0xff] %v2998_v29 }
  0xfa   :  { %2097 = vmatmul.msk.f32.gmra.mxu0 %vm77_vm1, %v2536_v14  ;;  %v2164_v14 = vld [vmem:[%s4300_s3 + $0x98] sm:$0xff] }
  0xfb   :  { %2130 = vmatmul.msk.f32.gmra.mxu1 %vm77_vm1, %v2566_v18  ;;  %1008 = vmatpush.msrb.mxu2 %v2164_v14 }
  0xff   :  { %v3006_v12 = vpop.f32.mrf.mxu0 }
 0x100   :  { %4315 = vst [vmem:[#allocation7_spill] sm:$0xff] %v3006_v12  ;;  %v3008_v39 = vpop.f32.mrf.mxu1 }
 0x101   :  { %4316 = vst [vmem:[#allocation8_spill] sm:$0xff] %v3008_v39 }
 0x102   :  { %2098 = vmatmul.msk.f32.gmra.mxu0 %vm77_vm1, %v2555_v17 }
 0x103   :  { %2131 = vmatmul.msk.f32.gmra.mxu1 %vm77_vm1, %v2577_v19 }
 0x107   :  { %v3022_v39 = vpop.f32.mrf.mxu0 }
 0x108   :  { %4317 = vst [vmem:[#allocation9_spill] sm:$0xff] %v3022_v39  ;;  %v3024_v12 = vpop.f32.mrf.mxu1  ;;  %v291_v39 = vadd.f32 %v2755_v42, %v2753_v41 }
 0x109   :  { %4318 = vst [vmem:[#allocation10_spill] sm:$0xff] %v3024_v12 }
 0x10a   :  { %2099 = vmatmul.msk.f32.gmra.mxu0 %vm77_vm1, %v2566_v18  ;;  %v950_v18 = vld [vmem:[%s4300_s3 + $0x38] sm:$0xff]  ;;  %v486_v48 = vadd.f32 %v2895_v3, %v291_v39 }
 0x10b   :  { %2132 = vmatmul.msk.f32.gmra.mxu1 %vm77_vm1, %v2594_v22  ;;  %1062 = vmatpush.msra.mxu3 %v950_v18 }
 0x10f   :  { %v3032_v17 = vpop.f32.mrf.mxu0 }
 0x110   :  { %4319 = vst [vmem:[#allocation11_spill] sm:$0xff] %v3032_v17  ;;  %v3034_v15 = vpop.f32.mrf.mxu1 }
 0x111   :  { %4320 = vst [vmem:[#allocation12_spill] sm:$0xff] %v3034_v15  ;;  %v2163_v15 = vld [vmem:[%s4300_s3 + $0x90] sm:$0xff] }
 0x112   :  { %2100 = vmatmul.msk.f32.gmra.mxu0 %vm77_vm1, %v2577_v19  ;;  %1009 = vmatpush.msrb.mxu2 %v2163_v15 }
 0x113   :  { %2133 = vmatmul.msk.f32.gmra.mxu1 %vm77_vm1, %v2605_v23 }
 0x117   :  { %v3045_v14 = vpop.f32.mrf.mxu0 }
 0x118   :  { %4321 = vst [vmem:[#allocation13_spill] sm:$0xff] %v3045_v14  ;;  %v3047_v12 = vpop.f32.mrf.mxu1 }
 0x119   :  { %4322 = vst [vmem:[#allocation14_spill] sm:$0xff] %v3047_v12  ;;  %v3066_v12 = vpop.f32.mrf.mxu3  ;;  %2089 = vmatmul.msk.f32.gmra.mxu3 %vm77_vm1, %v2868_v63 }
 0x11a   :  { %2101 = vmatmul.msk.f32.gmra.mxu0 %vm77_vm1, %v2594_v22  ;;  %4325 = vst [vmem:[#allocation17_spill] sm:$0xff] %v3066_v12 }
 0x11b   :  { %2134 = vmatmul.msk.f32.gmra.mxu1 %vm77_vm1, %v2616_v24 }
 0x11f   :  { %v3058_v19 = vpop.f32.mrf.mxu0 }
 0x120   :  { %4323 = vst [vmem:[#allocation15_spill] sm:$0xff] %v3058_v19  ;;  %v3060_v18 = vpop.f32.mrf.mxu1  ;;  %v949_v19 = vld [vmem:[%s4300_s3 + $0x30] sm:$0xff] }
 0x121   :  { %4324 = vst [vmem:[#allocation16_spill] sm:$0xff] %v3060_v18  ;;  %1063 = vmatpush.msra.mxu3 %v949_v19  ;;  %v3086_v12 = vpop.f32.mrf.mxu3 }
 0x122   :  { %2102 = vmatmul.msk.f32.gmra.mxu0 %vm77_vm1, %v2605_v23  ;;  %v2162_v23 = vld [vmem:[%s4300_s3 + $0x88] sm:$0xff]  ;;  %2090 = vmatmul.msk.f32.gmra.mxu3 %vm77_vm1, %v2885_v2 }
 0x123   :  { %2135 = vmatmul.msk.f32.gmra.mxu1 %vm77_vm1, %v2627_v25  ;;  %1010 = vmatpush.msrb.mxu2 %v2162_v23 }
 0x127   :  { %v3070_v22 = vpop.f32.mrf.mxu0 }
 0x128   :  { %4326 = vst [vmem:[#allocation18_spill] sm:$0xff] %v3070_v22  ;;  %v3072_v15 = vpop.f32.mrf.mxu1 }
 0x129   :  { %4327 = vst [vmem:[#allocation19_spill] sm:$0xff] %v3072_v15  ;;  %v3102_v23 = vpop.f32.mrf.mxu3 }
 0x12a   :  { %2103 = vmatmul.msk.f32.gmra.mxu0 %vm77_vm1, %v2616_v24  ;;  %2091 = vmatmul.msk.f32.gmra.mxu3 %vm77_vm1, %v2904_v6 }
 0x12b   :  { %2136 = vmatmul.msk.f32.gmra.mxu1 %vm77_vm1, %v2638_v26 }
 0x12f   :  { %v3088_v15 = vpop.f32.mrf.mxu0 }
 0x130   :  { %4328 = vst [vmem:[#allocation20_spill] sm:$0xff] %v3088_v15  ;;  %v3090_v22 = vpop.f32.mrf.mxu1 }
 0x131   :  { %4329 = vst [vmem:[#allocation21_spill] sm:$0xff] %v3090_v22 }
 0x132   :  { %2104 = vmatmul.msk.f32.gmra.mxu0 %vm77_vm1, %v2627_v25  ;;  %v948_v25 = vld [vmem:[%s4300_s3 + $0x28] sm:$0xff] }
 0x133   :  { %2137 = vmatmul.msk.f32.gmra.mxu1 %vm77_vm1, %v2649_v27  ;;  %1064 = vmatpush.msra.mxu3 %v948_v25 }
 0x137   :  { %v3098_v24 = vpop.f32.mrf.mxu0 }
 0x138   :  { %4330 = vst [vmem:[#allocation22_spill] sm:$0xff] %v3098_v24  ;;  %v3100_v19 = vpop.f32.mrf.mxu1 }
 0x139   :  { %4331 = vst [vmem:[#allocation23_spill] sm:$0xff] %v3100_v19  ;;  %v3119_v19 = vpop.f32.mrf.mxu3  ;;  %2092 = vmatmul.msk.f32.gmra.mxu3 %vm77_vm1, %v2921_v9 }
 0x13a   :  { %2105 = vmatmul.msk.f32.gmra.mxu0 %vm77_vm1, %v2638_v26  ;;  %v2161_v26 = vld [vmem:[%s4300_s3 + $0x80] sm:$0xff] }
 0x13b   :  { %2138 = vmatmul.msk.f32.gmra.mxu1 %vm77_vm1, %v2660_v28  ;;  %1011 = vmatpush.msrb.mxu2 %v2161_v26 }
 0x13f   :  { %v3113_v22 = vpop.f32.mrf.mxu0 }
 0x140   :  { %4332 = vst [vmem:[#allocation24_spill] sm:$0xff] %v3113_v22  ;;  %v3115_v24 = vpop.f32.mrf.mxu1 }
 0x141   :  { %4333 = vst [vmem:[#allocation25_spill] sm:$0xff] %v3115_v24 }
 0x142   :  { %2106 = vmatmul.msk.f32.gmra.mxu0 %vm77_vm1, %v2649_v27  ;;  %v3136_v27 = vpop.f32.mrf.mxu3  ;;  %2093 = vmatmul.msk.f32.gmra.mxu3 %vm77_vm1, %v2943_v20 }
 0x143   :  { %2139 = vmatmul.msk.f32.gmra.mxu1 %vm77_vm1, %v2677_v31 }
 0x147   :  { %v3128_v25 = vpop.f32.mrf.mxu0 }
 0x148   :  { %4334 = vst [vmem:[#allocation26_spill] sm:$0xff] %v3128_v25  ;;  %v3130_v22 = vpop.f32.mrf.mxu1  ;;  %v3156_v25 = vpop.f32.mrf.mxu2 }
 0x149   :  { %4335 = vst [vmem:[#allocation27_spill] sm:$0xff] %v3130_v22  ;;  %v946_v22 = vld [vmem:[%s4300_s3 + $0x18] sm:$0xff] }
 0x14a   :  { %2107 = vmatmul.msk.f32.gmra.mxu0 %vm77_vm1, %v2660_v28  ;;  %v947_v28 = vld [vmem:[%s4300_s3 + $0x20] sm:$0xff] }
 0x14b   :  { %2140 = vmatmul.msk.f32.gmra.mxu1 %vm77_vm1, %v2688_v32  ;;  %1065 = vmatpush.msra.mxu3 %v947_v28  ;;  %v944_v28 = vld [vmem:[%s4300_s3 + $0x8] sm:$0xff] }
 0x14d   :  { %1066 = vmatpush.msra.mxu3 %v946_v22  ;;  %v2160_v22 = vld [vmem:[%s4300_s3 + $0x78] sm:$0xff] }
 0x14e   :  { %1012 = vmatpush.msrb.mxu2 %v2160_v22 }
 0x14f   :  { %v3140_v24 = vpop.f32.mrf.mxu0 }
 0x150   :  { %4336 = vst [vmem:[#allocation28_spill] sm:$0xff] %v3140_v24  ;;  %v3142_v26 = vpop.f32.mrf.mxu1  ;;  %v945_v24 = vld [vmem:[%s4300_s3 + $0x10] sm:$0xff] }
 0x151   :  { %4337 = vst [vmem:[#allocation29_spill] sm:$0xff] %v3142_v26  ;;  %v3158_v26 = vpop.f32.mrf.mxu3  ;;  %1067 = vmatpush.msra.mxu3 %v945_v24  ;;  %v943_v24 = vld [vmem:[%s4300_s3] sm:$0xff] }
 0x152   :  { %2108 = vmatmul.msk.f32.gmra.mxu0 %vm77_vm1, %v2677_v31 }
 0x153   :  { %2141 = vmatmul.msk.f32.gmra.mxu1 %vm77_vm1, %v2699_v33  ;;  %1068 = vmatpush.msra.mxu3 %v944_v28  ;;  %v2159_v28 = vld [vmem:[%s4300_s3 + $0x70] sm:$0xff] }
 0x154   :  { %1013 = vmatpush.msrb.mxu2 %v2159_v28  ;;  %v2156_v28 = vld [vmem:[%s4300_s3 + $0x58] sm:$0xff] }
 0x155   :  { %1069 = vmatpush.msra.mxu3 %v943_v24  ;;  %v2158_v24 = vld [vmem:[%s4300_s3 + $0x68] sm:$0xff] }
 0x156   :  { %1014 = vmatpush.msrb.mxu2 %v2158_v24 }
 0x157   :  { %v3160_v31 = vpop.f32.mrf.mxu0 }
 0x158   :  { %4338 = vst [vmem:[#allocation30_spill] sm:$0xff] %v3160_v31  ;;  %v3165_v15 = vpop.f32.mrf.mxu1  ;;  %v3182_v31 = vpop.f32.mrf.mxu2 }
 0x159   :  { %4339 = vst [vmem:[#allocation31_spill] sm:$0xff] %v3165_v15 }
 0x15a   :  { %2109 = vmatmul.msk.f32.gmra.mxu0 %vm77_vm1, %v2688_v32  ;;  %v3186_v32 = vpop.f32.mrf.mxu3 }
 0x15b   :  { %2142 = vmatmul.msk.f32.gmra.mxu1 %vm77_vm1, %v2724_v37 }
 0x15f   :  { %v3180_v15 = vpop.f32.mrf.mxu0 }
 0x160   :  { %4340 = vst [vmem:[#allocation32_spill] sm:$0xff] %v3180_v15  ;;  %v3184_v18 = vpop.f32.mrf.mxu1 }
 0x161   :  { %4341 = vst [vmem:[#allocation33_spill] sm:$0xff] %v3184_v18  ;;  %v2157_v18 = vld [vmem:[%s4300_s3 + $0x60] sm:$0xff] }
 0x162   :  { %2110 = vmatmul.msk.f32.gmra.mxu0 %vm77_vm1, %v2699_v33  ;;  %v3201_v33 = vpop.f32.mrf.mxu2  ;;  %1015 = vmatpush.msrb.mxu2 %v2157_v18  ;;  %v3205_v14 = vpop.f32.mrf.mxu3 }
 0x163   :  { %2143 = vmatmul.msk.f32.gmra.mxu1 %vm77_vm1, %v2743_v40 }
 0x164   :  { %1016 = vmatpush.msrb.mxu2 %v2156_v28 }
 0x167   :  { %v648_v22 = vpop.f32.mrf.mxu0 }
 0x168   :  { %v757_v15 = vpop.f32.mrf.mxu1  ;;  %v649_v24 = vadd.f32 %v648_v22, %v3086_v12 }
 0x16a   :  { %2111 = vmatmul.msk.f32.gmra.mxu0 %vm77_vm1, %v2724_v37  ;;  %v294_v37 = vadd.f32 %v2772_v45, %v2770_v44  ;;  %v841_v18 = vadd.f32 %v757_v15, %v649_v24  ;;  %v3224_v12 = vpop.f32.mrf.mxu2  ;;  %v3229_v44 = vld [vmem:[%s4301_s2] ss:$0 sm:$0xff]  ;;  %v3231_v45 = vpop.f32.mrf.mxu3 }
 0x16b   :  { %2144 = vmatmul.msk.f32.gmra.mxu1 %vm77_vm1, %v2760_v43 }
 0x16c   :  { %v487_v47 = vadd.f32 %v2923_v10, %v294_v37  ;;  %v869_v41 = vmax.f32 %v486_v48, %v841_v18 }
 0x16f   :  { %v651_v17 = vpop.f32.mrf.mxu0 }
 0x170   :  { %v652_v29 = vadd.f32 %v651_v17, %v3102_v23  ;;  %v760_v13 = vpop.f32.mrf.mxu1  ;;  %v297_v17 = vadd.f32 %v2795_v50, %v2793_v49 }
 0x172   :  { %v842_v38 = vadd.f32 %v760_v13, %v652_v29  ;;  %2112 = vmatmul.msk.f32.gmra.mxu0 %vm77_vm1, %v2743_v40  ;;  %v3247_v48 = vpop.f32.mrf.mxu3 }
 0x173   :  { %2145 = vmatmul.msk.f32.gmra.mxu1 %vm77_vm1, %v2777_v46 }
 0x174   :  { %v870_v42 = vmax.f32 %v487_v47, %v842_v38  ;;  %v3245_v47 = vpop.f32.mrf.mxu2 }
 0x176   :  { %v897_v3 = vmax.f32 %v869_v41, %v870_v42  ;;  %v303_v42 = vadd.f32 %v2829_v56, %v2827_v55 }
 0x177   :  { %v654_v10 = vpop.f32.mrf.mxu0 }
 0x178   :  { %v3234_v13 = vadd.f32 %v3229_v44, %v897_v3  ;;  %v763_v40 = vpop.f32.mrf.mxu1  ;;  %v655_v38 = vadd.f32 %v654_v10, %v3119_v19  ;;  %v488_v19 = vadd.f32 %v2948_v21, %v297_v17  ;;  %v306_v3 = vadd.f32 %v2846_v59, %v2844_v58  ;;  %v2265_v58 = vld [vmem:[%s4300_s3 + $0x208] sm:$0xf]  ;;  %v2309_v59 = vld [vmem:[%s4300_s3 + $0x2b8] sm:$0xf] }
 0x179   :  { %2288 = vmatpush.msk.msra.mxu0 %vm997_vm2, %v2265_v58  ;;  %2310 = vmatpush.msk.msra.mxu1 %vm997_vm2, %v2309_v59  ;;  %v2256_v59 = vld [vmem:[%s4300_s3 + $0x1c0] sm:$0xff] }
 0x17a   :  { %v929_v29 = vmax.f32 %v3234_v13, 0.0  ;;  %2113 = vmatmul.msk.f32.gmra.mxu0 %vm77_vm1, %v2760_v43  ;;  %v300_v43 = vadd.f32 %v2812_v53, %v2810_v52  ;;  %v843_v15 = vadd.f32 %v763_v40, %v655_v38  ;;  %v3263_v41 = vpop.f32.mrf.mxu3  ;;  %v490_v38 = vadd.f32 %v3182_v31, %v303_v42  ;;  %v2196_v13 = vld [vmem:[%s4300_s3 + $0xe8] sm:$0xff] }
 0x17b   :  { %2146 = vmatmul.msk.f32.gmra.mxu1 %vm77_vm1, %v2800_v51  ;;  %v312_v42 = vadd.f32 %v2880_v1, %v2878_v0  ;;  %v2258_v0 = vld [vmem:[%s4300_s3 + $0x1d0] sm:$0xff]  ;;  %v2302_v1 = vld [vmem:[%s4300_s3 + $0x280] sm:$0xff] }
 0x17c   :  { %2179 = vmatmul.msk.f32.vlgmr.msra.gmra.mxu3 %vm966_vm3, %v929_v29  ;;  %v489_v28 = vadd.f32 %v3156_v25, %v300_v43  ;;  %v871_v37 = vmax.f32 %v488_v19, %v843_v15  ;;  %v3260_v52 = vpop.f32.mrf.mxu2  ;;  %v2307_v19 = vld [vmem:[%s4300_s3 + $0x2a8] sm:$0xff] }
 0x17f   :  { %v657_v39 = vpop.f32.mrf.mxu0 }
 0x180   :  { %v658_v23 = vadd.f32 %v657_v39, %v3136_v27  ;;  %v766_v22 = vpop.f32.mrf.mxu1 }
 0x182   :  { %v844_v24 = vadd.f32 %v766_v22, %v658_v23  ;;  %2114 = vmatmul.msk.f32.gmra.mxu0 %vm77_vm1, %v2777_v46  ;;  %v3287_v43 = vpop.f32.mrf.mxu3  ;;  %v2263_v22 = vld [vmem:[%s4300_s3 + $0x1f8] sm:$0xff] }
 0x183   :  { %2147 = vmatmul.msk.f32.gmra.mxu1 %vm77_vm1, %v2817_v54 }
 0x184   :  { %v872_v49 = vmax.f32 %v489_v28, %v844_v24  ;;  %v3283_v39 = vpop.f32.mrf.mxu2  ;;  %v2262_v24 = vld [vmem:[%s4300_s3 + $0x1f0] sm:$0xff] }
 0x186   :  { %v898_v50 = vmax.f32 %v871_v37, %v872_v49  ;;  %v2306_v37 = vld [vmem:[%s4300_s3 + $0x2a0] sm:$0xff] }
 0x187   :  { %v660_v18 = vpop.f32.mrf.mxu0 }
 0x188   :  { %v916_v53 = vadd.f32 %v3229_v44, %v898_v50  ;;  %v769_v27 = vpop.f32.mrf.mxu1  ;;  %v661_v46 = vadd.f32 %v660_v18, %v3158_v26  ;;  %v491_v26 = vadd.f32 %v3201_v33, %v306_v3  ;;  %v2308_v33 = vld [vmem:[%s4300_s3 + $0x2b0] sm:$0xff]  ;;  %v2305_v18 = vld [vmem:[%s4300_s3 + $0x298] sm:$0xff] }
 0x189   :  { %1471 = vmatpush.msra.mxu1 %v2308_v33  ;;  %v2255_v33 = vld [vmem:[%s4300_s3 + $0x1b8] sm:$0xff] }
 0x18a   :  { %v3265_v21 = vmax.f32 %v916_v53, 0.0  ;;  %2115 = vmatmul.msk.f32.gmra.mxu0 %vm77_vm1, %v2800_v51  ;;  %v845_v10 = vadd.f32 %v769_v27, %v661_v46  ;;  %v3337_v53 = vpop.f32.mrf.mxu3  ;;  %v2304_v46 = vld [vmem:[%s4300_s3 + $0x290] sm:$0xff] }
 0x18b   :  { %2148 = vmatmul.msk.f32.gmra.mxu1 %vm77_vm1, %v2834_v57 }
 0x18c   :  { %2168 = vmatmul.msk.f32.vlgmr.msrb.gmra.mxu2 %vm966_vm3, %v3265_v21  ;;  %2180 = vmatmul.msk.f32.gmra.mxu3 %vm966_vm3, %v3265_v21  ;;  %v873_v55 = vmax.f32 %v490_v38, %v845_v10  ;;  %v3324_v49 = vpop.f32.mrf.mxu2  ;;  %v2303_v38 = vld [vmem:[%s4300_s3 + $0x288] sm:$0xff] }
 0x18d   :  { %1472 = vmatpush.msra.mxu1 %v2307_v19 }
 0x18f   :  { %v663_v25 = vpop.f32.mrf.mxu0  ;;  %1473 = vmatpush.msra.mxu1 %v2306_v37 }
 0x190   :  { %v664_v51 = vadd.f32 %v663_v25, %v3186_v32  ;;  %v772_v40 = vpop.f32.mrf.mxu1  ;;  %v2264_v32 = vld [vmem:[%s4300_s3 + $0x200] sm:$0xff]  ;;  %v309_v25 = vadd.f32 %v2863_v62, %v2861_v61  ;;  %v493_v61 = vadd.f32 %v3245_v47, %v312_v42  ;;  %v2301_v47 = vld [vmem:[%s4300_s3 + $0x278] sm:$0xff] }
 0x191   :  { %1409 = vmatpush.msra.mxu0 %v2264_v32  ;;  %1474 = vmatpush.msra.mxu1 %v2305_v18 }
 0x192   :  { %v846_v17 = vadd.f32 %v772_v40, %v664_v51  ;;  %2116 = vmatmul.msk.f32.gmra.mxu0 %vm77_vm1, %v2817_v54  ;;  %v2259_v40 = vld [vmem:[%s4300_s3 + $0x1d8] sm:$0xff] }
 0x193   :  { %2149 = vmatmul.msk.f32.gmra.mxu1 %vm77_vm1, %v2851_v60  ;;  %1410 = vmatpush.msra.mxu0 %v2263_v22 }
 0x194   :  { %v874_v56 = vmax.f32 %v491_v26, %v846_v17  ;;  %1475 = vmatpush.msra.mxu1 %v2304_v46  ;;  %v492_v26 = vadd.f32 %v3224_v12, %v309_v25  ;;  %v3374_v17 = vpop.f32.mrf.mxu2 }
 0x195   :  { %1411 = vmatpush.msra.mxu0 %v2262_v24  ;;  %v318_v24 = vadd.f32 %v2916_v8, %v2914_v7 }
 0x196   :  { %v899_v31 = vmax.f32 %v873_v55, %v874_v56  ;;  %1476 = vmatpush.msra.mxu1 %v2303_v38  ;;  %v3376_v56 = vpop.f32.mrf.mxu3 }
 0x197   :  { %v666_v54 = vpop.f32.mrf.mxu0 }
 0x198   :  { %v917_v15 = vadd.f32 %v3229_v44, %v899_v31  ;;  %v775_v23 = vpop.f32.mrf.mxu1  ;;  %v667_v50 = vadd.f32 %v666_v54, %v3205_v14  ;;  %v2260_v14 = vld [vmem:[%s4300_s3 + $0x1e0] sm:$0xff]  ;;  %1477 = vmatpush.msra.mxu1 %v2302_v1  ;;  %v2300_v31 = vld [vmem:[%s4300_s3 + $0x270] sm:$0xff] }
 0x19a   :  { %v3312_v28 = vmax.f32 %v917_v15, 0.0  ;;  %2117 = vmatmul.msk.f32.gmra.mxu0 %vm77_vm1, %v2834_v57  ;;  %v2261_v57 = vld [vmem:[%s4300_s3 + $0x1e8] sm:$0xff]  ;;  %v847_v3 = vadd.f32 %v775_v23, %v667_v50  ;;  %1478 = vmatpush.msra.mxu1 %v2301_v47 }
 0x19b   :  { %2150 = vmatmul.msk.f32.gmra.mxu1 %vm77_vm1, %v2868_v63  ;;  %1412 = vmatpush.msra.mxu0 %v2261_v57  ;;  %v2299_v23 = vld [vmem:[%s4300_s3 + $0x268] sm:$0xff] }
 0x19c   :  { %2169 = vmatmul.msk.f32.gmra.mxu2 %vm966_vm3, %v3312_v28  ;;  %2181 = vmatmul.msk.f32.gmra.mxu3 %vm966_vm3, %v3312_v28  ;;  %v3406_v37 = vpop.f32.mrf.mxu2 }
 0x19d   :  { %1413 = vmatpush.msra.mxu0 %v2260_v14  ;;  %1479 = vmatpush.msra.mxu1 %v2300_v31  ;;  %v495_v14 = vadd.f32 %v3283_v39, %v318_v24  ;;  %v4343_v31 = vld [vmem:[#allocation3_spill] sm:$0xff] }
 0x19e   :  { %v3409_v18 = vpop.f32.mrf.mxu3 }
 0x19f   :  { %v669_v27 = vpop.f32.mrf.mxu0  ;;  %1414 = vmatpush.msra.mxu0 %v2259_v40  ;;  %1480 = vmatpush.msra.mxu1 %v2299_v23  ;;  %v324_v40 = vadd.f32 %v2962_v35, %v2960_v30 }
 0x1a0   :  { %v670_v10 = vadd.f32 %v669_v27, %v3231_v45  ;;  %v778_v51 = vpop.f32.mrf.mxu1  ;;  %v875_v45 = vmax.f32 %v492_v26, %v847_v3 }
 0x1a1   :  { %1415 = vmatpush.msra.mxu0 %v2258_v0  ;;  %v497_v0 = vadd.f32 %v3374_v17, %v324_v40 }
 0x1a2   :  { %v848_v62 = vadd.f32 %v778_v51, %v670_v10  ;;  %2118 = vmatmul.msk.f32.gmra.mxu0 %vm77_vm1, %v2851_v60  ;;  %v2257_v60 = vld [vmem:[%s4300_s3 + $0x1c8] sm:$0xff]  ;;  %v2220_v51 = vld [vmem:[%s4300_s3 + $0x150] sm:$0xff] }
 0x1a3   :  { %2151 = vmatmul.msk.f32.gmra.mxu1 %vm77_vm1, %v2885_v2  ;;  %1416 = vmatpush.msra.mxu0 %v2257_v60 }
 0x1a4   :  { %v876_v12 = vmax.f32 %v493_v61, %v848_v62  ;;  %v441_v42 = vpop.f32.mrf.mxu2 }
 0x1a5   :  { %1417 = vmatpush.msra.mxu0 %v2256_v59 }
 0x1a6   :  { %v900_v55 = vmax.f32 %v875_v45, %v876_v12  ;;  %v3428_v39 = vpop.f32.mrf.mxu3 }
 0x1a7   :  { %v672_v58 = vpop.f32.mrf.mxu0  ;;  %1418 = vmatpush.msra.mxu0 %v2255_v33 }
 0x1a8   :  { %v918_v54 = vadd.f32 %v3229_v44, %v900_v55  ;;  %v781_v32 = vpop.f32.mrf.mxu1  ;;  %v673_v22 = vadd.f32 %v672_v58, %v3247_v48 }
 0x1aa   :  { %v3388_v15 = vmax.f32 %v918_v54, 0.0  ;;  %2119 = vmatmul.msk.f32.gmra.mxu0 %vm77_vm1, %v2868_v63  ;;  %v315_v63 = vadd.f32 %v2899_v5, %v2897_v4  ;;  %v849_v50 = vadd.f32 %v781_v32, %v673_v22  ;;  %v4344_v54 = vld [vmem:[#allocation4_spill] sm:$0xff] }
 0x1ab   :  { %2152 = vmatmul.msk.f32.gmra.mxu1 %vm77_vm1, %v2904_v6  ;;  %v330_v32 = vadd.f32 %v4344_v54, %v4343_v31  ;;  %v4352_v31 = vld [vmem:[#allocation12_spill] sm:$0xff] }
 0x1ac   :  { %2170 = vmatmul.msk.f32.gmra.mxu2 %vm966_vm3, %v3388_v15  ;;  %2182 = vmatmul.msk.f32.gmra.mxu3 %vm966_vm3, %v3388_v15  ;;  %v494_v27 = vadd.f32 %v3260_v52, %v315_v63  ;;  %v2221_v52 = vld [vmem:[%s4300_s3 + $0x158] sm:$0xf]  ;;  %v3456_v45 = vpop.f32.mrf.mxu2 }
 0x1ad   :  { %2222 = vmatpush.msk.msrb.mxu3 %vm997_vm2, %v2221_v52  ;;  %v499_v63 = vadd.f32 %v441_v42, %v330_v32  ;;  %v4345_v42 = vld [vmem:[#allocation5_spill] sm:$0xff] }
 0x1ae   :  { %v877_v4 = vmax.f32 %v494_v27, %v849_v50  ;;  %v589_v30 = vpop.f32.mrf.mxu3 }
 0x1af   :  { %v675_v19 = vpop.f32.mrf.mxu0  ;;  %1200 = vmatpush.msrb.mxu3 %v2220_v51 }
 0x1b0   :  { %v676_v57 = vadd.f32 %v675_v19, %v3263_v41  ;;  %v784_v48 = vpop.f32.mrf.mxu1 }
 0x1b2   :  { %v850_v46 = vadd.f32 %v784_v48, %v676_v57  ;;  %2120 = vmatmul.msk.f32.gmra.mxu0 %vm77_vm1, %v2885_v2  ;;  %v2199_v2 = vld [vmem:[%s4300_s3 + $0x100] sm:$0xf] }
 0x1b3   :  { %2153 = vmatmul.msk.f32.gmra.mxu1 %vm77_vm1, %v2921_v9  ;;  %2200 = vmatpush.msk.msra.mxu2 %vm997_vm2, %v2199_v2  ;;  %v4346_v2 = vld [vmem:[#allocation6_spill] sm:$0xff] }
 0x1b4   :  { %v878_v5 = vmax.f32 %v495_v14, %v850_v46  ;;  %v447_v17 = vpop.f32.mrf.mxu2  ;;  %v333_v52 = vadd.f32 %v4346_v2, %v4345_v42  ;;  %v4353_v2 = vld [vmem:[#allocation13_spill] sm:$0xff] }
 0x1b6   :  { %v901_v7 = vmax.f32 %v877_v4, %v878_v5  ;;  %v592_v55 = vpop.f32.mrf.mxu3  ;;  %v2217_v5 = vld [vmem:[%s4300_s3 + $0x138] sm:$0xff]  ;;  %v500_v40 = vadd.f32 %v3456_v45, %v333_v52  ;;  %v2193_v45 = vld [vmem:[%s4300_s3 + $0xd0] sm:$0xff]  ;;  %v4354_v52 = vld [vmem:[#allocation14_spill] sm:$0xff] }
 0x1b7   :  { %v678_v8 = vpop.f32.mrf.mxu0 }
 0x1b8   :  { %v919_v41 = vadd.f32 %v3229_v44, %v901_v7  ;;  %v787_v25 = vpop.f32.mrf.mxu1  ;;  %v679_v10 = vadd.f32 %v678_v8, %v3287_v43  ;;  %v321_v43 = vadd.f32 %v2938_v16, %v2933_v11  ;;  %v2194_v8 = vld [vmem:[%s4300_s3 + $0xd8] sm:$0xff] }
 0x1ba   :  { %v3418_v3 = vmax.f32 %v919_v41, 0.0  ;;  %2121 = vmatmul.msk.f32.gmra.mxu0 %vm77_vm1, %v2904_v6  ;;  %v2198_v6 = vld [vmem:[%s4300_s3 + $0xf8] sm:$0xff]  ;;  %v851_v38 = vadd.f32 %v787_v25, %v679_v10  ;;  %v496_v62 = vadd.f32 %v3324_v49, %v321_v43  ;;  %v2216_v41 = vld [vmem:[%s4300_s3 + $0x130] sm:$0xff] }
 0x1bb   :  { %2154 = vmatmul.msk.f32.gmra.mxu1 %vm77_vm1, %v2943_v20  ;;  %1125 = vmatpush.msra.mxu2 %v2198_v6  ;;  %v4348_v10 = vld [vmem:[#allocation8_spill] sm:$0xff] }
 0x1bc   :  { %2171 = vmatmul.msk.f32.gmra.mxu2 %vm966_vm3, %v3418_v3  ;;  %2183 = vmatmul.msk.f32.gmra.mxu3 %vm966_vm3, %v3418_v3  ;;  %v879_v11 = vmax.f32 %v496_v62, %v851_v38  ;;  %v450_v27 = vpop.f32.mrf.mxu2 }
 0x1bf   :  { %v681_v20 = vpop.f32.mrf.mxu0 }
 0x1c0   :  { %v682_v26 = vadd.f32 %v681_v20, %v3337_v53  ;;  %v790_v61 = vpop.f32.mrf.mxu1 }
 0x1c2   :  { %v852_v1 = vadd.f32 %v790_v61, %v682_v26  ;;  %2122 = vmatmul.msk.f32.gmra.mxu0 %vm77_vm1, %v2921_v9  ;;  %v2219_v9 = vld [vmem:[%s4300_s3 + $0x148] sm:$0xff] }
 0x1c3   :  { %2155 = vmatmul.msk.f32.gmra.mxu1 %vm77_vm1, %v2710_v34  ;;  %v2197_v34 = vld [vmem:[%s4300_s3 + $0xf0] sm:$0xff]  ;;  %1201 = vmatpush.msrb.mxu3 %v2219_v9  ;;  %v2192_v9 = vld [vmem:[%s4300_s3 + $0xc8] sm:$0xff] }
 0x1c4   :  { %v880_v16 = vmax.f32 %v497_v0, %v852_v1  ;;  %1126 = vmatpush.msra.mxu2 %v2197_v34  ;;  %v453_v26 = vpop.f32.mrf.mxu2 }
 0x1c6   :  { %v902_v35 = vmax.f32 %v879_v11, %v880_v16  ;;  %1127 = vmatpush.msra.mxu2 %v2196_v13 }
 0x1c7   :  { %v684_v12 = vpop.f32.mrf.mxu0 }
 0x1c8   :  { %v920_v53 = vadd.f32 %v3229_v44, %v902_v35  ;;  %v793_v60 = vpop.f32.mrf.mxu1  ;;  %v685_v47 = vadd.f32 %v684_v12, %v3376_v56  ;;  %v4342_v56 = vld [vmem:[#allocation2_spill] sm:$0xff] }
 0x1c9   :  { %v327_v59 = vadd.f32 %v4342_v56, %v2970_v36 }
 0x1ca   :  { %v3459_v49 = vmax.f32 %v920_v53, 0.0  ;;  %2289 = vmatmul.msk.f32.vlgmr.msra.gmra.mxu0 %vm966_vm3, %v929_v29  ;;  %v2218_v29 = vld [vmem:[%s4300_s3 + $0x140] sm:$0xff]  ;;  %v853_v33 = vadd.f32 %v793_v60, %v685_v47  ;;  %v2215_v53 = vld [vmem:[%s4300_s3 + $0x128] sm:$0xff] }
 0x1cb   :  { %2311 = vmatmul.msk.f32.vlgmr.msra.gmra.mxu1 %vm966_vm3, %v3312_v28  ;;  %1202 = vmatpush.msrb.mxu3 %v2218_v29  ;;  %v498_v19 = vadd.f32 %v3406_v37, %v327_v59  ;;  %v2195_v37 = vld [vmem:[%s4300_s3 + $0xe0] sm:$0xff]  ;;  %v4351_v59 = vld [vmem:[#allocation11_spill] sm:$0xff] }
 0x1cc   :  { %2172 = vmatmul.msk.f32.gmra.mxu2 %vm966_vm3, %v3459_v49  ;;  %2184 = vmatmul.msk.f32.gmra.mxu3 %vm966_vm3, %v3459_v49  ;;  %v456_v60 = vpop.f32.mrf.mxu2  ;;  %v2214_v47 = vld [vmem:[%s4300_s3 + $0x120] sm:$0xff]  ;;  %v342_v54 = vadd.f32 %v4352_v31, %v4351_v59  ;;  %v4359_v31 = vld [vmem:[#allocation20_spill] sm:$0xff] }
 0x1cd   :  { %v881_v50 = vmax.f32 %v498_v19, %v853_v33  ;;  %1128 = vmatpush.msra.mxu2 %v2195_v37  ;;  %1203 = vmatpush.msrb.mxu3 %v2217_v5 }
 0x1cf   :  { %v687_v58 = vpop.f32.mrf.mxu0  ;;  %1129 = vmatpush.msra.mxu2 %v2194_v8  ;;  %1204 = vmatpush.msrb.mxu3 %v2216_v41  ;;  %v2190_v8 = vld [vmem:[%s4300_s3 + $0xb8] sm:$0xff] }
 0x1d0   :  { %v688_v23 = vadd.f32 %v687_v58, %v3409_v18  ;;  %v796_v22 = vpop.f32.mrf.mxu1  ;;  %v595_v18 = vpop.f32.mrf.mxu3  ;;  %v4350_v58 = vld [vmem:[#allocation10_spill] sm:$0xff] }
 0x1d1   :  { %1130 = vmatpush.msra.mxu2 %v2193_v45  ;;  %1205 = vmatpush.msrb.mxu3 %v2215_v53 }
 0x1d2   :  { %v854_v24 = vadd.f32 %v796_v22, %v688_v23  ;;  %2290 = vmatmul.msk.f32.gmra.mxu0 %vm966_vm3, %v3265_v21  ;;  %v2212_v22 = vld [vmem:[%s4300_s3 + $0x110] sm:$0xff] }
 0x1d3   :  { %2312 = vmatmul.msk.f32.gmra.mxu1 %vm966_vm3, %v3388_v15  ;;  %1131 = vmatpush.msra.mxu2 %v2192_v9  ;;  %v2276_v9 = vld [vmem:[%s4300_s3 + $0x260] sm:$0xf] }
 0x1d4   :  { %v882_v57 = vmax.f32 %v499_v63, %v854_v24  ;;  %1206 = vmatpush.msrb.mxu3 %v2214_v47  ;;  %v503_v63 = vadd.f32 %v453_v26, %v342_v54  ;;  %v4360_v54 = vld [vmem:[#allocation21_spill] sm:$0xff] }
 0x1d6   :  { %v903_v36 = vmax.f32 %v881_v50, %v882_v57  ;;  %v2211_v50 = vld [vmem:[%s4300_s3 + $0x108] sm:$0xff] }
 0x1d7   :  { %v690_v48 = vpop.f32.mrf.mxu0 }
 0x1d8   :  { %v921_v14 = vadd.f32 %v3229_v44, %v903_v36  ;;  %v799_v46 = vpop.f32.mrf.mxu1  ;;  %v691_v7 = vadd.f32 %v690_v48, %v3428_v39  ;;  %v4347_v39 = vld [vmem:[#allocation7_spill] sm:$0xff]  ;;  %v598_v62 = vpop.f32.mrf.mxu3 }
 0x1d9   :  { %v336_v6 = vadd.f32 %v4348_v10, %v4347_v39  ;;  %v459_v48 = vpop.f32.mrf.mxu2  ;;  %v345_v39 = vadd.f32 %v4354_v52, %v4353_v2  ;;  %v4355_v10 = vld [vmem:[#allocation15_spill] sm:$0xff] }
 0x1da   :  { %v3494_v4 = vmax.f32 %v921_v14, 0.0  ;;  %2291 = vmatmul.msk.f32.gmra.mxu0 %vm966_vm3, %v3312_v28  ;;  %v855_v51 = vadd.f32 %v799_v46, %v691_v7  ;;  %v2191_v7 = vld [vmem:[%s4300_s3 + $0xc0] sm:$0xff] }
 0x1db   :  { %2313 = vmatmul.msk.f32.gmra.mxu1 %vm966_vm3, %v3418_v3  ;;  %v501_v38 = vadd.f32 %v447_v17, %v336_v6  ;;  %v2213_v17 = vld [vmem:[%s4300_s3 + $0x118] sm:$0xff]  ;;  %1132 = vmatpush.msra.mxu2 %v2191_v7  ;;  %v4356_v6 = vld [vmem:[#allocation16_spill] sm:$0xff]  ;;  %v2241_v7 = vld [vmem:[%s4300_s3 + $0x1a0] sm:$0xff] }
 0x1dc   :  { %2173 = vmatmul.msk.f32.gmra.mxu2 %vm966_vm3, %v3494_v4  ;;  %2185 = vmatmul.msk.f32.gmra.mxu3 %vm966_vm3, %v3494_v4  ;;  %v883_v0 = vmax.f32 %v500_v40, %v855_v51  ;;  %v348_v51 = vadd.f32 %v4356_v6, %v4355_v10  ;;  %v4361_v10 = vld [vmem:[#allocation22_spill] sm:$0xff]  ;;  %v4362_v6 = vld [vmem:[#allocation23_spill] sm:$0xff] }
 0x1dd   :  { %1207 = vmatpush.msrb.mxu3 %v2213_v17  ;;  %1133 = vmatpush.msra.mxu2 %v2190_v8  ;;  %v2275_v17 = vld [vmem:[%s4300_s3 + $0x258] sm:$0xff]  ;;  %v2274_v8 = vld [vmem:[%s4300_s3 + $0x250] sm:$0xff] }
 0x1df   :  { %v693_v25 = vpop.f32.mrf.mxu0  ;;  %1208 = vmatpush.msrb.mxu3 %v2212_v22 }
 0x1e0   :  { %v694_v20 = vadd.f32 %v693_v25, %v589_v30  ;;  %v802_v43 = vpop.f32.mrf.mxu1  ;;  %v601_v13 = vpop.f32.mrf.mxu3  ;;  %v2189_v25 = vld [vmem:[%s4300_s3 + $0xb0] sm:$0xff] }
 0x1e1   :  { %1209 = vmatpush.msrb.mxu3 %v2211_v50  ;;  %1134 = vmatpush.msra.mxu2 %v2189_v25  ;;  %v2240_v25 = vld [vmem:[%s4300_s3 + $0x198] sm:$0xff] }
 0x1e2   :  { %v856_v61 = vadd.f32 %v802_v43, %v694_v20  ;;  %2292 = vmatmul.msk.f32.gmra.mxu0 %vm966_vm3, %v3388_v15  ;;  %v462_v20 = vpop.f32.mrf.mxu2 }
 0x1e3   :  { %2314 = vmatmul.msk.f32.gmra.mxu1 %vm966_vm3, %v3459_v49  ;;  %2277 = vmatpush.msk.msra.mxu3 %vm997_vm2, %v2276_v9  ;;  %v2272_v9 = vld [vmem:[%s4300_s3 + $0x240] sm:$0xff] }
 0x1e4   :  { %v884_v1 = vmax.f32 %v501_v38, %v856_v61  ;;  %v504_v61 = vadd.f32 %v456_v60, %v345_v39  ;;  %v2243_v60 = vld [vmem:[%s4300_s3 + $0x1b0] sm:$0xf] }
 0x1e5   :  { %2244 = vmatpush.msk.msrb.mxu2 %vm997_vm2, %v2243_v60  ;;  %1359 = vmatpush.msra.mxu3 %v2275_v17  ;;  %v2239_v60 = vld [vmem:[%s4300_s3 + $0x190] sm:$0xff] }
 0x1e6   :  { %v904_v11 = vmax.f32 %v883_v0, %v884_v1  ;;  %v2270_v17 = vld [vmem:[%s4300_s3 + $0x230] sm:$0xff] }
 0x1e7   :  { %v696_v16 = vpop.f32.mrf.mxu0  ;;  %1360 = vmatpush.msra.mxu3 %v2274_v8  ;;  %v4367_v8 = vld [vmem:[#allocation26_spill] sm:$0xff] }
 0x1e8   :  { %v922_v35 = vadd.f32 %v3229_v44, %v904_v11  ;;  %v805_v30 = vpop.f32.mrf.mxu1  ;;  %v697_v34 = vadd.f32 %v696_v16, %v592_v55  ;;  %v4349_v55 = vld [vmem:[#allocation9_spill] sm:$0xff]  ;;  %v604_v46 = vpop.f32.mrf.mxu3 }
 0x1e9   :  { %v339_v56 = vadd.f32 %v4350_v58, %v4349_v55  ;;  %v4357_v58 = vld [vmem:[#allocation18_spill] sm:$0xff] }
 0x1ea   :  { %v3527_v12 = vmax.f32 %v922_v35, 0.0  ;;  %2293 = vmatmul.msk.f32.gmra.mxu0 %vm966_vm3, %v3418_v3  ;;  %v857_v32 = vadd.f32 %v805_v30, %v697_v34  ;;  %v465_v53 = vpop.f32.mrf.mxu2 }
 0x1eb   :  { %2315 = vmatmul.msk.f32.gmra.mxu1 %vm966_vm3, %v3494_v4  ;;  %v502_v19 = vadd.f32 %v450_v27, %v339_v56  ;;  %v4358_v56 = vld [vmem:[#allocation19_spill] sm:$0xff] }
 0x1ec   :  { %2174 = vmatmul.msk.f32.gmra.mxu2 %vm966_vm3, %v3527_v12  ;;  %2186 = vmatmul.msk.f32.gmra.mxu3 %vm966_vm3, %v3527_v12  ;;  %v351_v59 = vadd.f32 %v4358_v56, %v4357_v58  ;;  %v2236_v58 = vld [vmem:[%s4300_s3 + $0x178] sm:$0xff]  ;;  %v2269_v56 = vld [vmem:[%s4300_s3 + $0x228] sm:$0xff] }
 0x1ed   :  { %v885_v57 = vmax.f32 %v502_v19, %v857_v32  ;;  %v354_v32 = vadd.f32 %v4360_v54, %v4359_v31 }
 0x1ee   :  { %v506_v19 = vadd.f32 %v462_v20, %v351_v59  ;;  %v4363_v20 = vld [vmem:[#allocation24_spill] sm:$0xff] }
 0x1ef   :  { %v699_v29 = vpop.f32.mrf.mxu0 }
 0x1f0   :  { %v700_v33 = vadd.f32 %v699_v29, %v595_v18  ;;  %v808_v23 = vpop.f32.mrf.mxu1  ;;  %v607_v26 = vpop.f32.mrf.mxu3  ;;  %v2242_v29 = vld [vmem:[%s4300_s3 + $0x1a8] sm:$0xff] }
 0x1f1   :  { %1275 = vmatpush.msrb.mxu2 %v2242_v29  ;;  %v2237_v29 = vld [vmem:[%s4300_s3 + $0x180] sm:$0xff] }
 0x1f2   :  { %v858_v24 = vadd.f32 %v808_v23, %v700_v33  ;;  %2294 = vmatmul.msk.f32.gmra.mxu0 %vm966_vm3, %v3459_v49  ;;  %v468_v50 = vpop.f32.mrf.mxu2 }
 0x1f3   :  { %2316 = vmatmul.msk.f32.gmra.mxu1 %vm966_vm3, %v3527_v12  ;;  %1276 = vmatpush.msrb.mxu2 %v2241_v7 }
 0x1f4   :  { %v886_v36 = vmax.f32 %v503_v63, %v858_v24  ;;  %v507_v63 = vadd.f32 %v465_v53, %v354_v32 }
 0x1f5   :  { %1277 = vmatpush.msrb.mxu2 %v2240_v25 }
 0x1f6   :  { %v905_v14 = vmax.f32 %v885_v57, %v886_v36 }
 0x1f7   :  { %v702_v27 = vpop.f32.mrf.mxu0  ;;  %1278 = vmatpush.msrb.mxu2 %v2239_v60 }
 0x1f8   :  { %v923_v18 = vadd.f32 %v3229_v44, %v905_v14  ;;  %v811_v37 = vpop.f32.mrf.mxu1  ;;  %v703_v41 = vadd.f32 %v702_v27, %v598_v62  ;;  %v505_v62 = vadd.f32 %v459_v48, %v348_v51  ;;  %v610_v47 = vpop.f32.mrf.mxu3  ;;  %v357_v51 = vadd.f32 %v4362_v6, %v4361_v10 }
 0x1fa   :  { %v3567_v5 = vmax.f32 %v923_v18, 0.0  ;;  %2295 = vmatmul.msk.f32.gmra.mxu0 %vm966_vm3, %v3494_v4  ;;  %v859_v43 = vadd.f32 %v811_v37, %v703_v41  ;;  %v471_v2 = vpop.f32.mrf.mxu2 }
 0x1fc   :  { %2175 = vmatmul.msk.f32.gmra.mxu2 %vm966_vm3, %v3567_v5  ;;  %2187 = vmatmul.msk.f32.gmra.mxu3 %vm966_vm3, %v3567_v5  ;;  %v887_v1 = vmax.f32 %v504_v61, %v859_v43  ;;  %v4364_v43 = vld [vmem:[#allocation25_spill] sm:$0xff] }
 0x1fd   :  { %2317 = vmatmul.msk.f32.gmra.mxu1 %vm966_vm3, %v3567_v5 }
 0x1ff   :  { %v705_v42 = vpop.f32.mrf.mxu0 }
 0x200   :  { %v706_v40 = vadd.f32 %v705_v42, %v601_v13  ;;  %v814_v38 = vpop.f32.mrf.mxu1  ;;  %v613_v48 = vpop.f32.mrf.mxu3  ;;  %v2273_v42 = vld [vmem:[%s4300_s3 + $0x248] sm:$0xff] }
 0x201   :  { %1361 = vmatpush.msra.mxu3 %v2273_v42 }
 0x202   :  { %v860_v0 = vadd.f32 %v814_v38, %v706_v40  ;;  %2296 = vmatmul.msk.f32.gmra.mxu0 %vm966_vm3, %v3527_v12  ;;  %v360_v40 = vadd.f32 %v4364_v43, %v4363_v20  ;;  %v474_v31 = vpop.f32.mrf.mxu2 }
 0x203   :  { %1362 = vmatpush.msra.mxu3 %v2272_v9  ;;  %v2328_v9 = vld [vmem:[%s4300_s3 + $0x2f8] sm:$0xff] }
 0x204   :  { %v888_v11 = vmax.f32 %v505_v62, %v860_v0  ;;  %v508_v62 = vadd.f32 %v468_v50, %v357_v51  ;;  %v509_v0 = vadd.f32 %v471_v2, %v360_v40  ;;  %v2331_v40 = vld [vmem:[%s4300_s3 + $0x310] sm:$0xf] }
 0x206   :  { %v906_v16 = vmax.f32 %v887_v1, %v888_v11 }
 0x207   :  { %v708_v35 = vpop.f32.mrf.mxu0 }
 0x208   :  { %v924_v30 = vadd.f32 %v3229_v44, %v906_v16  ;;  %v817_v45 = vpop.f32.mrf.mxu1  ;;  %v709_v13 = vadd.f32 %v708_v35, %v604_v46  ;;  %v616_v52 = vpop.f32.mrf.mxu3 }
 0x20a   :  { %v3593_v34 = vmax.f32 %v924_v30, 0.0  ;;  %2297 = vmatmul.msk.f32.gmra.mxu0 %vm966_vm3, %v3567_v5  ;;  %v861_v33 = vadd.f32 %v817_v45, %v709_v13  ;;  %v2271_v13 = vld [vmem:[%s4300_s3 + $0x238] sm:$0xff]  ;;  %v477_v50 = vpop.f32.mrf.mxu2 }
 0x20b   :  { %1363 = vmatpush.msra.mxu3 %v2271_v13 }
 0x20c   :  { %2176 = vmatmul.msk.f32.gmra.mxu2 %vm966_vm3, %v3593_v34  ;;  %2188 = vmatmul.msk.f32.gmra.mxu3 %vm966_vm3, %v3593_v34  ;;  %v889_v57 = vmax.f32 %v506_v19, %v861_v33  ;;  %v2268_v33 = vld [vmem:[%s4300_s3 + $0x220] sm:$0xff]  ;;  %v2266_v19 = vld [vmem:[%s4300_s3 + $0x210] sm:$0xff] }
 0x20d   :  { %2318 = vmatmul.msk.f32.gmra.mxu1 %vm966_vm3, %v3593_v34  ;;  %1364 = vmatpush.msra.mxu3 %v2270_v17 }
 0x20f   :  { %v711_v55 = vpop.f32.mrf.mxu0  ;;  %1365 = vmatpush.msra.mxu3 %v2269_v56  ;;  %v2326_v56 = vld [vmem:[%s4300_s3 + $0x2e8] sm:$0xff] }
 0x210   :  { %v712_v23 = vadd.f32 %v711_v55, %v607_v26  ;;  %v820_v22 = vpop.f32.mrf.mxu1  ;;  %v619_v45 = vpop.f32.mrf.mxu3 }
 0x211   :  { %1366 = vmatpush.msra.mxu3 %v2268_v33  ;;  %v2325_v33 = vld [vmem:[%s4300_s3 + $0x2e0] sm:$0xff] }
 0x212   :  { %v862_v24 = vadd.f32 %v820_v22, %v712_v23  ;;  %2298 = vmatmul.msk.f32.gmra.mxu0 %vm966_vm3, %v3593_v34  ;;  %v2235_v23 = vld [vmem:[%s4300_s3 + $0x170] sm:$0xff]  ;;  %v2267_v22 = vld [vmem:[%s4300_s3 + $0x218] sm:$0xff]  ;;  %v3731_v6 = vpop.f32.mrf.mxu2 }
 0x213   :  { %1367 = vmatpush.msra.mxu3 %v2267_v22 }
 0x214   :  { %v890_v36 = vmax.f32 %v507_v63, %v862_v24  ;;  %2223 = vmatmul.msk.f32.vlgmr.msrb.gmra.mxu3 %vm966_vm3, %v3388_v15  ;;  %v2234_v24 = vld [vmem:[%s4300_s3 + $0x168] sm:$0xff] }
 0x215   :  { %1368 = vmatpush.msra.mxu3 %v2266_v19 }
 0x216   :  { %v907_v14 = vmax.f32 %v889_v57, %v890_v36 }
 0x217   :  { %v714_v46 = vpop.f32.mrf.mxu0 }
 0x218   :  { %v925_v27 = vadd.f32 %v3229_v44, %v907_v14  ;;  %v823_v18 = vpop.f32.mrf.mxu1  ;;  %v715_v41 = vadd.f32 %v714_v46, %v610_v47  ;;  %v2238_v47 = vld [vmem:[%s4300_s3 + $0x188] sm:$0xff]  ;;  %v3681_v55 = vpop.f32.mrf.mxu3  ;;  %v4365_v46 = vld [vmem:[#allocation28_spill] sm:$0xff] }
 0x219   :  { %1279 = vmatpush.msrb.mxu2 %v2238_v47 }
 0x21a   :  { %v3626_v37 = vmax.f32 %v925_v27, 0.0  ;;  %v863_v38 = vadd.f32 %v823_v18, %v715_v41  ;;  %v4366_v27 = vld [vmem:[#allocation29_spill] sm:$0xff]  ;;  %v4368_v41 = vld [vmem:[#allocation27_spill] sm:$0xff] }
 0x21b   :  { %1280 = vmatpush.msrb.mxu2 %v2237_v29  ;;  %v366_v18 = vadd.f32 %v4366_v27, %v4365_v46  ;;  %v363_v25 = vadd.f32 %v4368_v41, %v4367_v8  ;;  %v2327_v29 = vld [vmem:[%s4300_s3 + $0x2f0] sm:$0xff]  ;;  %v2344_v46 = vld [vmem:[%s4300_s3 + $0x320] sm:$0xff]  ;;  %v2343_v27 = vld [vmem:[%s4300_s3 + $0x318] sm:$0xff] }
 0x21c   :  { %2177 = vmatmul.msk.f32.gmra.mxu2 %vm966_vm3, %v3626_v37  ;;  %2224 = vmatmul.msk.f32.gmra.mxu3 %vm966_vm3, %v3418_v3  ;;  %v891_v11 = vmax.f32 %v508_v62, %v863_v38  ;;  %v2353_v38 = vld [vmem:[%s4300_s3 + $0x368] sm:$0xf] }
 0x21d   :  { %2319 = vmatmul.msk.f32.gmra.mxu1 %vm966_vm3, %v3626_v37  ;;  %1281 = vmatpush.msrb.mxu2 %v2236_v58  ;;  %v511_v42 = vadd.f32 %v477_v50, %v366_v18  ;;  %v2322_v18 = vld [vmem:[%s4300_s3 + $0x2c8] sm:$0xff] }
 0x21e   :  { %2354 = vmatpush.msk.msrb.mxu3 %vm997_vm2, %v2353_v38 }
 0x21f   :  { %v717_v39 = vpop.f32.mrf.mxu0  ;;  %1282 = vmatpush.msrb.mxu2 %v2235_v23  ;;  %v2347_v23 = vld [vmem:[%s4300_s3 + $0x338] sm:$0xff] }
 0x220   :  { %v718_v26 = vadd.f32 %v717_v39, %v613_v48  ;;  %v826_v61 = vpop.f32.mrf.mxu1  ;;  %v3697_v54 = vpop.f32.mrf.mxu3  ;;  %v510_v39 = vadd.f32 %v474_v31, %v363_v25  ;;  %v2321_v25 = vld [vmem:[%s4300_s3 + $0x2c0] sm:$0xff] }
 0x221   :  { %1283 = vmatpush.msrb.mxu2 %v2234_v24  ;;  %v2346_v24 = vld [vmem:[%s4300_s3 + $0x330] sm:$0xff] }
 0x222   :  { %v864_v1 = vadd.f32 %v826_v61, %v718_v26  ;;  %v3748_v61 = vpop.f32.mrf.mxu2 }
 0x224   :  { %v892_v16 = vmax.f32 %v509_v0, %v864_v1  ;;  %2201 = vmatmul.msk.f32.vlgmr.msra.gmra.mxu2 %vm966_vm3, %v3312_v28  ;;  %2225 = vmatmul.msk.f32.gmra.mxu3 %vm966_vm3, %v3459_v49  ;;  %v2330_v1 = vld [vmem:[%s4300_s3 + $0x308] sm:$0xff] }
 0x226   :  { %v908_v35 = vmax.f32 %v891_v11, %v892_v16 }
 0x227   :  { %v720_v59 = vpop.f32.mrf.mxu0 }
 0x228   :  { %v926_v30 = vadd.f32 %v3229_v44, %v908_v35  ;;  %v829_v32 = vpop.f32.mrf.mxu1  ;;  %v3718_v36 = vpop.f32.mrf.mxu3  ;;  %v721_v48 = vadd.f32 %v720_v59, %v616_v52  ;;  %v2233_v52 = vld [vmem:[%s4300_s3 + $0x160] sm:$0xff] }
 0x229   :  { %1284 = vmatpush.msrb.mxu2 %v2233_v52  ;;  %v2329_v35 = vld [vmem:[%s4300_s3 + $0x300] sm:$0xff] }
 0x22a   :  { %v3655_v53 = vmax.f32 %v926_v30, 0.0  ;;  %v865_v2 = vadd.f32 %v829_v32, %v721_v48  ;;  %v3764_v11 = vpop.f32.mrf.mxu2  ;;  %v2351_v30 = vld [vmem:[%s4300_s3 + $0x358] sm:$0xff]  ;;  %v2348_v59 = vld [vmem:[%s4300_s3 + $0x340] sm:$0xff]  ;;  %v2345_v48 = vld [vmem:[%s4300_s3 + $0x328] sm:$0xff] }
 0x22b   :  { %2332 = vmatpush.msk.msra.mxu2 %vm997_vm2, %v2331_v40 }
 0x22c   :  { %2202 = vmatmul.msk.f32.gmra.mxu2 %vm966_vm3, %v3388_v15  ;;  %2226 = vmatmul.msk.f32.gmra.mxu3 %vm966_vm3, %v3494_v4  ;;  %v893_v20 = vmax.f32 %v510_v39, %v865_v2 }
 0x22d   :  { %2320 = vmatmul.msk.f32.gmra.mxu1 %vm966_vm3, %v3655_v53  ;;  %1543 = vmatpush.msra.mxu2 %v2330_v1  ;;  %v4370_v1 = vld [vmem:[#allocation33_spill] sm:$0xff] }
 0x22f   :  { %v723_v63 = vpop.f32.mrf.mxu0  ;;  %1544 = vmatpush.msra.mxu2 %v2329_v35 }
 0x230   :  { %v724_v57 = vadd.f32 %v723_v63, %v619_v45  ;;  %v832_v14 = vpop.f32.mrf.mxu1  ;;  %v3733_v51 = vpop.f32.mrf.mxu3  ;;  %v2324_v63 = vld [vmem:[%s4300_s3 + $0x2d8] sm:$0xff] }
 0x231   :  { %1545 = vmatpush.msra.mxu2 %v2328_v9 }
 0x232   :  { %v866_v7 = vadd.f32 %v832_v14, %v724_v57  ;;  %v3778_v45 = vpop.f32.mrf.mxu2  ;;  %v2323_v14 = vld [vmem:[%s4300_s3 + $0x2d0] sm:$0xff] }
 0x233   :  { %1546 = vmatpush.msra.mxu2 %v2327_v29 }
 0x234   :  { %2203 = vmatmul.msk.f32.gmra.mxu2 %vm966_vm3, %v3418_v3  ;;  %2227 = vmatmul.msk.f32.gmra.mxu3 %vm966_vm3, %v3527_v12  ;;  %v894_v10 = vmax.f32 %v511_v42, %v866_v7 }
 0x235   :  { %1547 = vmatpush.msra.mxu2 %v2326_v56  ;;  %v4372_v56 = vld [vmem:[#allocation31_spill] sm:$0xff] }
 0x236   :  { %v909_v43 = vmax.f32 %v893_v20, %v894_v10  ;;  %v1072_v20 = vadd.f32 %v3718_v36, %v3748_v61 }
 0x237   :  { %1548 = vmatpush.msra.mxu2 %v2325_v33  ;;  %v726_v41 = vpop.f32.mrf.mxu0  ;;  %v4373_v33 = vld [vmem:[#allocation17_spill] sm:$0xff] }
 0x238   :  { %v927_v26 = vadd.f32 %v3229_v44, %v909_v43  ;;  %v3750_v62 = vpop.f32.mrf.mxu3  ;;  %v2352_v44 = vld [vmem:[%s4300_s3 + $0x360] sm:$0xff]  ;;  %v835_v42 = vpop.f32.mrf.mxu1  ;;  %v727_v35 = vadd.f32 %v726_v41, %v3681_v55  ;;  %v1075_v55 = vadd.f32 %v3733_v51, %v3764_v11 }
 0x239   :  { %1615 = vmatpush.msrb.mxu3 %v2352_v44  ;;  %1549 = vmatpush.msra.mxu2 %v2324_v63  ;;  %v2422_v51 = vld [vmem:[%s4301_s2] ss:$0 sm:$0xff] }
 0x23a   :  { %v3752_v0 = vmax.f32 %v927_v26, 0.0  ;;  %v4369_v26 = vld [vmem:[#allocation32_spill] sm:$0xff]  ;;  %v867_v36 = vadd.f32 %v835_v42, %v727_v35 }
 0x23b   :  { %1616 = vmatpush.msrb.mxu3 %v2351_v30  ;;  %1550 = vmatpush.msra.mxu2 %v2323_v14  ;;  %v372_v44 = vadd.f32 %v4370_v1, %v4369_v26 }
 0x23c   :  { %2204 = vmatmul.msk.f32.gmra.mxu2 %vm966_vm3, %v3459_v49  ;;  %2228 = vmatmul.msk.f32.gmra.mxu3 %vm966_vm3, %v3567_v5 }
 0x23d   :  { %1551 = vmatpush.msra.mxu2 %v2322_v18 }
 0x23f   :  { %v3792_v47 = vpop.f32.mrf.mxu2  ;;  %1552 = vmatpush.msra.mxu2 %v2321_v25  ;;  %v729_v10 = vpop.f32.mrf.mxu0 }
 0x240   :  { %v3766_v16 = vpop.f32.mrf.mxu3  ;;  %v730_v43 = vadd.f32 %v729_v10, %v3697_v54  ;;  %v838_v9 = vpop.f32.mrf.mxu1 }
 0x241   :  { %v1081_v42 = vadd.f32 %v3766_v16, %v3792_v47 }
 0x244   :  { %2205 = vmatmul.msk.f32.gmra.mxu2 %vm966_vm3, %v3494_v4  ;;  %2229 = vmatmul.msk.f32.gmra.mxu3 %vm966_vm3, %v3593_v34 }
 0x248   :  { %v3780_v60 = vpop.f32.mrf.mxu3 }
 0x24c   :  { %2206 = vmatmul.msk.f32.gmra.mxu2 %vm966_vm3, %v3527_v12  ;;  %2230 = vmatmul.msk.f32.gmra.mxu3 %vm966_vm3, %v3626_v37 }
 0x24f   :  { %v3806_v17 = vpop.f32.mrf.mxu2 }
 0x250   :  { %v3794_v13 = vpop.f32.mrf.mxu3  ;;  %v1084_v10 = vadd.f32 %v3780_v60, %v3806_v17 }
 0x254   :  { %2207 = vmatmul.msk.f32.gmra.mxu2 %vm966_vm3, %v3567_v5  ;;  %2231 = vmatmul.msk.f32.gmra.mxu3 %vm966_vm3, %v3655_v53 }
 0x25c   :  { %2208 = vmatmul.msk.f32.gmra.mxu2 %vm966_vm3, %v3593_v34  ;;  %2232 = vmatmul.msk.f32.gmra.mxu3 %vm966_vm3, %v3752_v0 }
 0x25f   :  { %v3808_v58 = vpop.f32.mrf.mxu3  ;;  %v3820_v31 = vpop.f32.mrf.mxu2 }
 0x264   :  { %2209 = vmatmul.msk.f32.gmra.mxu2 %vm966_vm3, %v3626_v37  ;;  %2278 = vmatmul.msk.f32.vlgmr.msra.gmra.mxu3 %vm966_vm3, %v3265_v21  ;;  %v2350_v21 = vld [vmem:[%s4300_s3 + $0x350] sm:$0xff] }
 0x265   :  { %1617 = vmatpush.msrb.mxu3 %v2350_v21  ;;  %v868_v21 = vadd.f32 %v838_v9, %v730_v43 }
 0x26c   :  { %2210 = vmatmul.msk.f32.gmra.mxu2 %vm966_vm3, %v3655_v53  ;;  %2279 = vmatmul.msk.f32.gmra.mxu3 %vm966_vm3, %v3312_v28  ;;  %v2349_v28 = vld [vmem:[%s4300_s3 + $0x348] sm:$0xff] }
 0x26d   :  { %1618 = vmatpush.msrb.mxu3 %v2349_v28  ;;  %v4371_v28 = vld [vmem:[#allocation30_spill] sm:$0xff] }
 0x26f   :  { %1619 = vmatpush.msrb.mxu3 %v2348_v59  ;;  %v3822_v32 = vpop.f32.mrf.mxu3  ;;  %v3834_v22 = vpop.f32.mrf.mxu2  ;;  %v369_v59 = vadd.f32 %v4372_v56, %v4371_v28 }
 0x271   :  { %1620 = vmatpush.msrb.mxu3 %v2347_v23  ;;  %v513_v23 = vadd.f32 %v4373_v33, %v372_v44  ;;  %v512_v54 = vadd.f32 %v3731_v6, %v369_v59  ;;  %v1078_v6 = vadd.f32 %v3750_v62, %v3778_v45 }
 0x273   :  { %1621 = vmatpush.msrb.mxu3 %v2346_v24  ;;  %v896_v61 = vmax.f32 %v513_v23, %v868_v21 }
 0x274   :  { %2245 = vmatmul.msk.f32.vlgmr.msrb.gmra.mxu2 %vm966_vm3, %v3418_v3  ;;  %2280 = vmatmul.msk.f32.gmra.mxu3 %vm966_vm3, %v3388_v15 }
 0x275   :  { %1622 = vmatpush.msrb.mxu3 %v2345_v48 }
 0x277   :  { %1623 = vmatpush.msrb.mxu3 %v2344_v46 }
 0x279   :  { %1624 = vmatpush.msrb.mxu3 %v2343_v27 }
 0x27c   :  { %2246 = vmatmul.msk.f32.gmra.mxu2 %vm966_vm3, %v3459_v49  ;;  %2281 = vmatmul.msk.f32.gmra.mxu3 %vm966_vm3, %v3418_v3 }
 0x27f   :  { %v3836_v19 = vpop.f32.mrf.mxu3  ;;  %v3848_v50 = vpop.f32.mrf.mxu2 }
 0x284   :  { %2247 = vmatmul.msk.f32.gmra.mxu2 %vm966_vm3, %v3494_v4  ;;  %2282 = vmatmul.msk.f32.gmra.mxu3 %vm966_vm3, %v3459_v49 }
 0x28c   :  { %2248 = vmatmul.msk.f32.gmra.mxu2 %vm966_vm3, %v3527_v12  ;;  %2283 = vmatmul.msk.f32.gmra.mxu3 %vm966_vm3, %v3494_v4 }
 0x28f   :  { %v1098_v57 = vpop.f32.mrf.mxu3  ;;  %v3869_v7 = vpop.f32.mrf.mxu2 }
 0x294   :  { %2249 = vmatmul.msk.f32.gmra.mxu2 %vm966_vm3, %v3567_v5  ;;  %2284 = vmatmul.msk.f32.gmra.mxu3 %vm966_vm3, %v3527_v12 }
 0x297   :  { %v1211_v8 = vpop.f32.mrf.mxu3 }
 0x29c   :  { %2250 = vmatmul.msk.f32.gmra.mxu2 %vm966_vm3, %v3593_v34  ;;  %2285 = vmatmul.msk.f32.gmra.mxu3 %vm966_vm3, %v3567_v5 }
 0x29f   :  { %v1045_v2 = vpop.f32.mrf.mxu2  ;;  %v1214_v52 = vpop.f32.mrf.mxu3 }
 0x2a0   :  { %v3878_v39 = vadd.f32 %v1098_v57, %v1045_v2  ;;  %v895_v57 = vmax.f32 %v512_v54, %v867_v36 }
 0x2a2   :  { %v910_v14 = vmax.f32 %v895_v57, %v896_v61  ;;  %v2386_v57 = vld [vmem:[%s4303_s5 + $0xe8] sm:$0xff] }
 0x2a3   :  { %1783 = vmatpush.msrb.mxu2 %v2386_v57 }
 0x2a4   :  { %2251 = vmatmul.msk.f32.gmra.mxu2 %vm966_vm3, %v3626_v37  ;;  %2286 = vmatmul.msk.f32.gmra.mxu3 %vm966_vm3, %v3593_v34  ;;  %v928_v11 = vadd.f32 %v2422_v51, %v910_v14  ;;  %v1704_v14 = vld [vmem:[%s4303_s5 + $0x48] sm:$0xff]  ;;  %v1703_v51 = vld [vmem:[%s4303_s5 + $0x40] sm:$0xff] }
 0x2a5   :  { %1749 = vmatpush.msrb.mxu1 %v1704_v14  ;;  %v2393_v14 = vld [vmem:[%s4303_s5 + $0x118] sm:$0xff] }
 0x2a6   :  { %v942_v41 = vmax.f32 %v928_v11, 0.0  ;;  %v2385_v11 = vld [vmem:[%s4303_s5 + $0xe0] sm:$0xff] }
 0x2a7   :  { %v1136_v40 = vpop.f32.mrf.mxu2  ;;  %v1217_v38 = vpop.f32.mrf.mxu3  ;;  %1750 = vmatpush.msrb.mxu1 %v1703_v51  ;;  %1784 = vmatpush.msrb.mxu2 %v2385_v11  ;;  %v2365_v11 = vld [vmem:[%s4303_s5 + $0x50] sm:$0xff] }
 0x2a8   :  { %v1166_v30 = vadd.f32 %v1136_v40, %v1072_v20 }
 0x2aa   :  { %v3890_v29 = vadd.f32 %v1211_v8, %v1166_v30 }
 0x2ac   :  { %2252 = vmatmul.msk.f32.gmra.mxu2 %vm966_vm3, %v3655_v53  ;;  %2287 = vmatmul.msk.f32.gmra.mxu3 %vm966_vm3, %v3626_v37 }
 0x2af   :  { %v1139_v63 = vpop.f32.mrf.mxu2  ;;  %v1220_v24 = vpop.f32.mrf.mxu3 }
 0x2b0   :  { %v1167_v48 = vadd.f32 %v1139_v63, %v1075_v55 }
 0x2b2   :  { %v3902_v46 = vadd.f32 %v1214_v52, %v1167_v48  ;;  %v2397_v48 = vld [vmem:[%s4303_s5 + $0x138] sm:$0xff] }
 0x2b3   :  { %1818 = vmatpush.msra.mxu3 %v2397_v48  ;;  %v2382_v48 = vld [vmem:[%s4303_s5 + $0xc8] sm:$0xff] }
 0x2b4   :  { %2253 = vmatmul.msk.f32.gmra.mxu2 %vm966_vm3, %v3752_v0  ;;  %2355 = vmatmul.msk.f32.vlgmr.msrb.gmra.mxu3 %vm966_vm3, %v3418_v3 }
 0x2b7   :  { %v1142_v27 = vpop.f32.mrf.mxu2  ;;  %v1223_v18 = vpop.f32.mrf.mxu3 }
 0x2b8   :  { %v1168_v8 = vadd.f32 %v1142_v27, %v1078_v6  ;;  %v2373_v27 = vld [vmem:[%s4303_s5 + $0x90] sm:$0xff] }
 0x2ba   :  { %v1243_v25 = vadd.f32 %v1217_v38, %v1168_v8  ;;  %v1702_v8 = vld [vmem:[%s4303_s5 + $0x38] sm:$0xff] }
 0x2bb   :  { %1751 = vmatpush.msrb.mxu1 %v1702_v8 }
 0x2bc   :  { %2254 = vmatmul.msk.f32.gmra.mxu2 %vm966_vm3, %v942_v41  ;;  %2356 = vmatmul.msk.f32.gmra.mxu3 %vm966_vm3, %v3459_v49 }
 0x2bf   :  { %v1145_v2 = vpop.f32.mrf.mxu2  ;;  %v1226_v62 = vpop.f32.mrf.mxu3 }
 0x2c0   :  { %v1169_v45 = vadd.f32 %v1145_v2, %v1081_v42  ;;  %v1701_v2 = vld [vmem:[%s4303_s5 + $0x30] sm:$0xff] }
 0x2c1   :  { %1752 = vmatpush.msrb.mxu1 %v1701_v2 }
 0x2c2   :  { %v1244_v52 = vadd.f32 %v1220_v24, %v1169_v45  ;;  %v1700_v45 = vld [vmem:[%s4303_s5 + $0x28] sm:$0xff] }
 0x2c3   :  { %1753 = vmatpush.msrb.mxu1 %v1700_v45 }
 0x2c4   :  { %2333 = vmatmul.msk.f32.vlgmr.msra.gmra.mxu2 %vm966_vm3, %v3388_v15  ;;  %2357 = vmatmul.msk.f32.gmra.mxu3 %vm966_vm3, %v3494_v4  ;;  %v1087_v15 = vadd.f32 %v3794_v13, %v3820_v31 }
 0x2c7   :  { %v1148_v20 = vpop.f32.mrf.mxu2  ;;  %v3924_v43 = vpop.f32.mrf.mxu3 }
 0x2c8   :  { %v1170_v40 = vadd.f32 %v1148_v20, %v1084_v10  ;;  %v1698_v10 = vld [vmem:[%s4303_s5 + $0x18] sm:$0xff] }
 0x2ca   :  { %v1245_v38 = vadd.f32 %v1223_v18, %v1170_v40  ;;  %v2396_v18 = vld [vmem:[%s4303_s5 + $0x130] sm:$0xff] }
 0x2cb   :  { %1819 = vmatpush.msra.mxu3 %v2396_v18  ;;  %v2392_v18 = vld [vmem:[%s4303_s5 + $0x110] sm:$0xff] }
 0x2cc   :  { %2334 = vmatmul.msk.f32.gmra.mxu2 %vm966_vm3, %v3418_v3  ;;  %2358 = vmatmul.msk.f32.gmra.mxu3 %vm966_vm3, %v3527_v12  ;;  %v1093_v3 = vadd.f32 %v3822_v32, %v3848_v50 }
 0x2cf   :  { %v1151_v16 = vpop.f32.mrf.mxu2  ;;  %v1232_v47 = vpop.f32.mrf.mxu3 }
 0x2d0   :  { %v1171_v26 = vadd.f32 %v1151_v16, %v1087_v15 }
 0x2d2   :  { %v1246_v1 = vadd.f32 %v1226_v62, %v1171_v26  ;;  %v2384_v26 = vld [vmem:[%s4303_s5 + $0xd8] sm:$0xff] }
 0x2d3   :  { %1785 = vmatpush.msrb.mxu2 %v2384_v26 }
 0x2d4   :  { %2335 = vmatmul.msk.f32.gmra.mxu2 %vm966_vm3, %v3459_v49  ;;  %2359 = vmatmul.msk.f32.gmra.mxu3 %vm966_vm3, %v3567_v5  ;;  %v1096_v49 = vadd.f32 %v3836_v19, %v3869_v7 }
 0x2d7   :  { %v3936_v60 = vpop.f32.mrf.mxu2  ;;  %v1235_v17 = vpop.f32.mrf.mxu3 }
 0x2dc   :  { %2336 = vmatmul.msk.f32.gmra.mxu2 %vm966_vm3, %v3494_v4  ;;  %2360 = vmatmul.msk.f32.gmra.mxu3 %vm966_vm3, %v3593_v34 }
 0x2df   :  { %v1157_v13 = vpop.f32.mrf.mxu2  ;;  %v1238_v31 = vpop.f32.mrf.mxu3 }
 0x2e0   :  { %v1173_v44 = vadd.f32 %v1157_v13, %v1093_v3  ;;  %v1482_v3 = vpop.f32.mrf.mxu1  ;;  %v1695_v13 = vld [vmem:[%s4303_s5] sm:$0xff] }
 0x2e2   :  { %v3944_v35 = vadd.f32 %v1232_v47, %v1173_v44  ;;  %v1696_v47 = vld [vmem:[%s4303_s5 + $0x8] sm:$0xff]  ;;  %v2371_v44 = vld [vmem:[%s4303_s5 + $0x80] sm:$0xff] }
 0x2e4   :  { %2337 = vmatmul.msk.f32.gmra.mxu2 %vm966_vm3, %v3527_v12  ;;  %2361 = vmatmul.msk.f32.gmra.mxu3 %vm966_vm3, %v3626_v37 }
 0x2e7   :  { %v1160_v4 = vpop.f32.mrf.mxu2  ;;  %v3952_v30 = vpop.f32.mrf.mxu3 }
 0x2e8   :  { %v1174_v9 = vadd.f32 %v1160_v4, %v1096_v49 }
 0x2ea   :  { %v3954_v21 = vadd.f32 %v1235_v17, %v1174_v9  ;;  %v2395_v17 = vld [vmem:[%s4303_s5 + $0x128] sm:$0xff] }
 0x2eb   :  { %1820 = vmatpush.msra.mxu3 %v2395_v17 }
 0x2ec   :  { %2338 = vmatmul.msk.f32.gmra.mxu2 %vm966_vm3, %v3567_v5  ;;  %2362 = vmatmul.msk.f32.gmra.mxu3 %vm966_vm3, %v3655_v53 }
 0x2ef   :  { %v1163_v32 = vpop.f32.mrf.mxu2  ;;  %v3960_v12 = vpop.f32.mrf.mxu3 }
 0x2f0   :  { %v1175_v50 = vadd.f32 %v1163_v32, %v3878_v39 }
 0x2f2   :  { %v3963_v28 = vadd.f32 %v1238_v31, %v1175_v50  ;;  %v2383_v31 = vld [vmem:[%s4303_s5 + $0xd0] sm:$0xff] }
 0x2f3   :  { %1786 = vmatpush.msrb.mxu2 %v2383_v31 }
 0x2f4   :  { %2339 = vmatmul.msk.f32.gmra.mxu2 %vm966_vm3, %v3593_v34  ;;  %2363 = vmatmul.msk.f32.gmra.mxu3 %vm966_vm3, %v3752_v0 }
 0x2f5   :  { %1787 = vmatpush.msrb.mxu2 %v2382_v48 }
 0x2f7   :  { %v1286_v19 = vpop.f32.mrf.mxu2  ;;  %v3969_v7 = vpop.f32.mrf.mxu3 }
 0x2f8   :  { %v3972_v5 = vadd.f32 %v1286_v19, %v3890_v29  ;;  %v2369_v19 = vld [vmem:[%s4303_s5 + $0x70] sm:$0xff] }
 0x2fc   :  { %2340 = vmatmul.msk.f32.gmra.mxu2 %vm966_vm3, %v3626_v37  ;;  %2364 = vmatmul.msk.f32.gmra.mxu3 %vm966_vm3, %v942_v41  ;;  %v1420_v41 = vpop.f32.mrf.mxu0 }
 0x2fd   :  { %v1421_v32 = vadd.f32 %v1420_v41, %v3952_v30 }
 0x2ff   :  { %v1289_v39 = vpop.f32.mrf.mxu2  ;;  %v3977_v56 = vpop.f32.mrf.mxu3 }
 0x300   :  { %v3980_v59 = vadd.f32 %v1289_v39, %v3902_v46  ;;  %v1485_v39 = vpop.f32.mrf.mxu1 }
 0x304   :  { %2341 = vmatmul.msk.f32.gmra.mxu2 %vm966_vm3, %v3655_v53  ;;  %v1423_v16 = vpop.f32.mrf.mxu0 }
 0x305   :  { %v1424_v57 = vadd.f32 %v1423_v16, %v3960_v12  ;;  %v2381_v12 = vld [vmem:[%s4303_s5 + $0xc0] sm:$0xff] }
 0x306   :  { %1788 = vmatpush.msrb.mxu2 %v2381_v12 }
 0x307   :  { %v1292_v34 = vpop.f32.mrf.mxu2  ;;  %v3984_v33 = vpop.f32.mrf.mxu3  ;;  %v1513_v41 = vadd.f32 %v1485_v39, %v1424_v57 }
 0x308   :  { %v3986_v23 = vadd.f32 %v1292_v34, %v1243_v25  ;;  %v1512_v34 = vadd.f32 %v1482_v3, %v1421_v32 }
 0x30c   :  { %2342 = vmatmul.msk.f32.gmra.mxu2 %vm966_vm3, %v3752_v0  ;;  %v2374_v0 = vld [vmem:[%s4303_s5 + $0x98] sm:$0xff]  ;;  %v1426_v50 = vpop.f32.mrf.mxu0 }
 0x30d   :  { %1726 = vmatpush.msrb.mxu0 %v2374_v0 }
 0x30f   :  { %v1295_v37 = vpop.f32.mrf.mxu2  ;;  %v3990_v29 = vpop.f32.mrf.mxu3  ;;  %1727 = vmatpush.msrb.mxu0 %v2373_v27 }
 0x310   :  { %v3992_v36 = vadd.f32 %v1295_v37, %v1244_v52  ;;  %v1699_v52 = vld [vmem:[%s4303_s5 + $0x20] sm:$0xff] }
 0x311   :  { %1754 = vmatpush.msrb.mxu1 %v1699_v52  ;;  %v1427_v52 = vadd.f32 %v1426_v50, %v3969_v7  ;;  %v2379_v7 = vld [vmem:[%s4303_s5 + $0xb0] sm:$0xff] }
 0x313   :  { %1755 = vmatpush.msrb.mxu1 %v1698_v10 }
 0x314   :  { %v1429_v8 = vpop.f32.mrf.mxu0 }
 0x315   :  { %v1430_v31 = vadd.f32 %v1429_v8, %v3977_v56  ;;  %v2390_v56 = vld [vmem:[%s4303_s5 + $0x100] sm:$0xff] }
 0x316   :  { %v2407_v8 = vld [vmem:[%s4303_s5 + $0x180] sm:$0xff] }
 0x317   :  { %v1298_v54 = vpop.f32.mrf.mxu2  ;;  %v3994_v55 = vpop.f32.mrf.mxu3 }
 0x318   :  { %v3996_v61 = vadd.f32 %v1298_v54, %v1245_v38  ;;  %v1697_v38 = vld [vmem:[%s4303_s5 + $0x10] sm:$0xff]  ;;  %v2367_v54 = vld [vmem:[%s4303_s5 + $0x60] sm:$0xff] }
 0x319   :  { %1756 = vmatpush.msrb.mxu1 %v1697_v38  ;;  %v2380_v38 = vld [vmem:[%s4303_s5 + $0xb8] sm:$0xff] }
 0x31a   :  { %1789 = vmatpush.msrb.mxu2 %v2380_v38 }
 0x31b   :  { %1757 = vmatpush.msrb.mxu1 %v1696_v47 }
 0x31c   :  { %v1432_v26 = vpop.f32.mrf.mxu0  ;;  %1790 = vmatpush.msrb.mxu2 %v2379_v7 }
 0x31d   :  { %1758 = vmatpush.msrb.mxu1 %v1695_v13  ;;  %v2378_v13 = vld [vmem:[%s4303_s5 + $0xa8] sm:$0xff] }
 0x31e   :  { %1791 = vmatpush.msrb.mxu2 %v2378_v13 }
 0x31f   :  { %v1301_v63 = vpop.f32.mrf.mxu2  ;;  %v3998_v53 = vpop.f32.mrf.mxu3 }
 0x320   :  { %v4000_v24 = vadd.f32 %v1301_v63, %v1246_v1  ;;  %v2372_v1 = vld [vmem:[%s4303_s5 + $0x88] sm:$0xff]  ;;  %v2366_v63 = vld [vmem:[%s4303_s5 + $0x58] sm:$0xff] }
 0x321   :  { %1728 = vmatpush.msrb.mxu0 %v2372_v1 }
 0x323   :  { %1729 = vmatpush.msrb.mxu0 %v2371_v44 }
 0x327   :  { %v4014_v46 = vpop.f32.mrf.mxu2  ;;  %v4016_v6 = vpop.f32.mrf.mxu3 }
 0x32f   :  { %v1307_v25 = vpop.f32.mrf.mxu2  ;;  %v4033_v42 = vpop.f32.mrf.mxu3 }
 0x330   :  { %v4039_v62 = vadd.f32 %v1307_v25, %v3944_v35  ;;  %v2394_v35 = vld [vmem:[%s4303_s5 + $0x120] sm:$0xff]  ;;  %v1488_v25 = vpop.f32.mrf.mxu1 }
 0x331   :  { %1821 = vmatpush.msra.mxu3 %v2394_v35  ;;  %v1514_v47 = vadd.f32 %v1488_v25, %v1427_v52  ;;  %v2405_v52 = vld [vmem:[%s4303_s5 + $0x170] sm:$0xff] }
 0x333   :  { %1822 = vmatpush.msra.mxu3 %v2393_v14 }
 0x335   :  { %1823 = vmatpush.msra.mxu3 %v2392_v18  ;;  %v2388_v18 = vld [vmem:[%s4303_s5 + $0xf0] sm:$0xff] }
 0x337   :  { %v1310_v20 = vpop.f32.mrf.mxu2  ;;  %v1626_v40 = vpop.f32.mrf.mxu3 }
 0x338   :  { %v4054_v15 = vadd.f32 %v1310_v20, %v3954_v21  ;;  %v2370_v21 = vld [vmem:[%s4303_s5 + $0x78] sm:$0xff]  ;;  %v4121_v20 = vld [vmem:[%s4302_s4] ss:$0 sm:$0xff]  ;;  %v1491_v3 = vpop.f32.mrf.mxu1 }
 0x339   :  { %1730 = vmatpush.msrb.mxu0 %v2370_v21  ;;  %v1515_v32 = vadd.f32 %v1491_v3, %v1430_v31  ;;  %v2401_v3 = vld [vmem:[%s4303_s5 + $0x150] sm:$0xff]  ;;  %v2400_v31 = vld [vmem:[%s4303_s5 + $0x148] sm:$0xff] }
 0x33b   :  { %1731 = vmatpush.msrb.mxu0 %v2369_v19 }
 0x33f   :  { %v1313_v49 = vpop.f32.mrf.mxu2  ;;  %v1629_v9 = vpop.f32.mrf.mxu3 }
 0x340   :  { %v4081_v4 = vadd.f32 %v1313_v49, %v3963_v28  ;;  %v2368_v28 = vld [vmem:[%s4303_s5 + $0x68] sm:$0xff] }
 0x341   :  { %1732 = vmatpush.msrb.mxu0 %v2368_v28  ;;  %v2391_v49 = vld [vmem:[%s4303_s5 + $0x108] sm:$0xff]  ;;  %v1435_v28 = vpop.f32.mrf.mxu0 }
 0x342   :  { %1824 = vmatpush.msra.mxu3 %v2391_v49 }
 0x343   :  { %1733 = vmatpush.msrb.mxu0 %v2367_v54  ;;  %v1494_v54 = vpop.f32.mrf.mxu1 }
 0x344   :  { %1825 = vmatpush.msra.mxu3 %v2390_v56 }
 0x345   :  { %1734 = vmatpush.msrb.mxu0 %v2366_v63 }
 0x347   :  { %v1554_v37 = vpop.f32.mrf.mxu2  ;;  %v1632_v51 = vpop.f32.mrf.mxu3  ;;  %1735 = vmatpush.msrb.mxu0 %v2365_v11  ;;  %v2408_v11 = vld [vmem:[%s4303_s5 + $0x188] sm:$0xff] }
 0x348   :  { %v1584_v30 = vadd.f32 %v1554_v37, %v1512_v34  ;;  %v1433_v34 = vadd.f32 %v1432_v26, %v3984_v33  ;;  %v1436_v33 = vadd.f32 %v1435_v28, %v3990_v29  ;;  %v2406_v29 = vld [vmem:[%s4303_s5 + $0x178] sm:$0xff] }
 0x349   :  { %1853 = vmatpush.msra.mxu0 %v2408_v11 }
 0x34a   :  { %v1656_v0 = vadd.f32 %v1626_v40, %v1584_v30  ;;  %v1516_v63 = vadd.f32 %v1494_v54, %v1433_v34 }
 0x34b   :  { %v1497_v25 = vpop.f32.mrf.mxu1  ;;  %1854 = vmatpush.msra.mxu0 %v2407_v8 }
 0x34c   :  { %v1666_v27 = vmax.f32 %v3972_v5, %v1656_v0 }
 0x34d   :  { %1855 = vmatpush.msra.mxu0 %v2406_v29 }
 0x34f   :  { %v1557_v2 = vpop.f32.mrf.mxu2  ;;  %v1635_v40 = vpop.f32.mrf.mxu3  ;;  %1856 = vmatpush.msra.mxu0 %v2405_v52  ;;  %v1881_v52 = vld [vmem:[%s4306_s7 + $0x40] sm:$0xff] }
 0x350   :  { %v1585_v45 = vadd.f32 %v1557_v2, %v1513_v41  ;;  %v1517_v2 = vadd.f32 %v1497_v25, %v1436_v33 }
 0x352   :  { %v1657_v10 = vadd.f32 %v1629_v9, %v1585_v45  ;;  %v2377_v9 = vld [vmem:[%s4303_s5 + $0xa0] sm:$0xff] }
 0x353   :  { %1792 = vmatpush.msrb.mxu2 %v2377_v9  ;;  %v1500_v7 = vpop.f32.mrf.mxu1 }
 0x354   :  { %v1667_v5 = vmax.f32 %v3980_v59, %v1657_v10 }
 0x356   :  { %v1676_v16 = vmax.f32 %v1666_v27, %v1667_v5  ;;  %v1090_v5 = vadd.f32 %v3808_v58, %v3834_v22  ;;  %v2402_v58 = vld [vmem:[%s4303_s5 + $0x158] sm:$0xff] }
 0x357   :  { %v1560_v1 = vpop.f32.mrf.mxu2  ;;  %v1638_v50 = vpop.f32.mrf.mxu3 }
 0x358   :  { %v1685_v59 = vadd.f32 %v4121_v20, %v1676_v16  ;;  %v1586_v17 = vadd.f32 %v1560_v1, %v1514_v47  ;;  %v2403_v47 = vld [vmem:[%s4303_s5 + $0x160] sm:$0xff]  ;;  %v1172_v26 = vadd.f32 %v3936_v60, %v1090_v5  ;;  %v1878_v5 = vld [vmem:[%s4306_s7 + $0x28] sm:$0xff] }
 0x35a   :  { %v1690_v44 = vmax.f32 %v1685_v59, 0.0  ;;  %v1658_v35 = vadd.f32 %v1632_v51, %v1586_v17  ;;  %v2389_v51 = vld [vmem:[%s4303_s5 + $0xf8] sm:$0xff]  ;;  %v1247_v13 = vadd.f32 %v3924_v43, %v1172_v26  ;;  %v1873_v26 = vld [vmem:[%s4306_s7] sm:$0xff] }
 0x35b   :  { %1826 = vmatpush.msra.mxu3 %v2389_v51  ;;  %v1503_v56 = vpop.f32.mrf.mxu1 }
 0x35c   :  { %v1668_v21 = vmax.f32 %v3986_v23, %v1658_v35  ;;  %2376 = vmatmul.msk.f32.vlgmr.msrb.gmra.mxu1 %vm1716_vm4, %v1690_v44  ;;  %v1322_v35 = vadd.f32 %v4014_v46, %v1247_v13  ;;  %v1918_v13 = vld [vmem:[%s4307_s9 + $0x10] sm:$0xff] }
 0x35d   :  { %1827 = vmatpush.msra.mxu3 %v2388_v18 }
 0x35f   :  { %v1563_v19 = vpop.f32.mrf.mxu2  ;;  %v1641_v14 = vpop.f32.mrf.mxu3 }
 0x360   :  { %v1587_v39 = vadd.f32 %v1563_v19, %v1515_v32 }
 0x362   :  { %v1659_v37 = vadd.f32 %v1635_v40, %v1587_v39 }
 0x364   :  { %v1669_v30 = vmax.f32 %v3992_v36, %v1659_v37  ;;  %v1438_v36 = vpop.f32.mrf.mxu0  ;;  %v1506_v37 = vpop.f32.mrf.mxu1 }
 0x365   :  { %v1439_v40 = vadd.f32 %v1438_v36, %v3994_v55 }
 0x366   :  { %v1677_v23 = vmax.f32 %v1668_v21, %v1669_v30  ;;  %v2399_v21 = vld [vmem:[%s4303_s5 + $0x140] sm:$0xff] }
 0x367   :  { %v1566_v57 = vpop.f32.mrf.mxu2  ;;  %v1644_v16 = vpop.f32.mrf.mxu3  ;;  %v1518_v55 = vadd.f32 %v1500_v7, %v1439_v40  ;;  %v1877_v40 = vld [vmem:[%s4306_s7 + $0x20] sm:$0xff]  ;;  %v1925_v7 = vld [vmem:[%s4307_s9 + $0x48] sm:$0xff] }
 0x368   :  { %v1686_v0 = vadd.f32 %v4121_v20, %v1677_v23  ;;  %v1588_v48 = vadd.f32 %v1566_v57, %v1516_v63 }
 0x36a   :  { %v1691_v27 = vmax.f32 %v1686_v0, 0.0  ;;  %v1660_v12 = vadd.f32 %v1638_v50, %v1588_v48 }
 0x36c   :  { %v1670_v41 = vmax.f32 %v3996_v61, %v1660_v12  ;;  %2375 = vmatmul.msk.f32.vlgmr.msrb.gmra.mxu0 %vm1716_vm4, %v1691_v27  ;;  %v2404_v61 = vld [vmem:[%s4303_s5 + $0x168] sm:$0xff]  ;;  %v1441_v59 = vpop.f32.mrf.mxu0 }
 0x36d   :  { %1857 = vmatpush.msra.mxu0 %v2404_v61  ;;  %v1442_v44 = vadd.f32 %v1441_v59, %v3998_v53  ;;  %v1879_v61 = vld [vmem:[%s4306_s7 + $0x30] sm:$0xff]  ;;  %v1924_v59 = vld [vmem:[%s4307_s9 + $0x40] sm:$0xff] }
 0x36f   :  { %v1569_v45 = vpop.f32.mrf.mxu2  ;;  %1858 = vmatpush.msra.mxu0 %v2403_v47  ;;  %v1647_v32 = vpop.f32.mrf.mxu3  ;;  %v1519_v50 = vadd.f32 %v1503_v56, %v1442_v44  ;;  %v1874_v47 = vld [vmem:[%s4306_s7 + $0x8] sm:$0xff] }
 0x370   :  { %v1589_v10 = vadd.f32 %v1569_v45, %v1517_v2  ;;  %v1885_v2 = vld [vmem:[%s4306_s7 + $0x60] sm:$0xff]  ;;  %v1882_v45 = vld [vmem:[%s4306_s7 + $0x48] sm:$0xff] }
 0x371   :  { %1859 = vmatpush.msra.mxu0 %v2402_v58  ;;  %v1923_v58 = vld [vmem:[%s4307_s9 + $0x38] sm:$0xff] }
 0x372   :  { %v1661_v38 = vadd.f32 %v1641_v14, %v1589_v10  ;;  %v1880_v10 = vld [vmem:[%s4306_s7 + $0x38] sm:$0xff] }
 0x373   :  { %1860 = vmatpush.msra.mxu0 %v2401_v3  ;;  %v1919_v3 = vld [vmem:[%s4307_s9 + $0x18] sm:$0xff] }
 0x374   :  { %v1671_v1 = vmax.f32 %v4000_v24, %v1661_v38  ;;  %v1444_v19 = vpop.f32.mrf.mxu0  ;;  %v1876_v38 = vld [vmem:[%s4306_s7 + $0x18] sm:$0xff] }
 0x375   :  { %1861 = vmatpush.msra.mxu0 %v2400_v31  ;;  %v1445_v53 = vadd.f32 %v1444_v19, %v4016_v6  ;;  %v1509_v6 = vpop.f32.mrf.mxu1  ;;  %v1916_v19 = vld [vmem:[%s4307_s9] sm:$0xff] }
 0x376   :  { %v1678_v22 = vmax.f32 %v1670_v41, %v1671_v1  ;;  %v1926_v1 = vld [vmem:[%s4307_s9 + $0x50] sm:$0xf] }
 0x377   :  { %v1572_v17 = vpop.f32.mrf.mxu2  ;;  %1862 = vmatpush.msra.mxu0 %v2399_v21  ;;  %v1520_v30 = vadd.f32 %v1506_v37, %v1445_v53  ;;  %v1650_v23 = vpop.f32.mrf.mxu3  ;;  %2411 = vmatpush.msk.msra.mxu2 %vm997_vm2, %v1926_v1  ;;  %v2419_v21 = vld [vmem:[%s4304_s6] ss:$0 sm:$0xff] }
 0x378   :  { %v1687_v60 = vadd.f32 %v4121_v20, %v1678_v22  ;;  %v1590_v24 = vadd.f32 %v1572_v17, %v1518_v55  ;;  %v1922_v22 = vld [vmem:[%s4307_s9 + $0x30] sm:$0xff]  ;;  %v1921_v55 = vld [vmem:[%s4307_s9 + $0x28] sm:$0xff]  ;;  %v1920_v17 = vld [vmem:[%s4307_s9 + $0x20] sm:$0xff] }
 0x379   :  { %1943 = vmatpush.msra.mxu2 %v1925_v7 }
 0x37a   :  { %v1692_v49 = vmax.f32 %v1687_v60, 0.0  ;;  %v1662_v9 = vadd.f32 %v1644_v16, %v1590_v24  ;;  %v1875_v16 = vld [vmem:[%s4306_s7 + $0x10] sm:$0xff] }
 0x37b   :  { %1944 = vmatpush.msra.mxu2 %v1924_v59 }
 0x37c   :  { %v1672_v43 = vmax.f32 %v1322_v35, %v1662_v9  ;;  %2387 = vmatmul.msk.f32.vlgmr.msrb.gmra.mxu2 %vm1716_vm4, %v1692_v49  ;;  %v1447_v48 = vpop.f32.mrf.mxu0 }
 0x37d   :  { %v1448_v14 = vadd.f32 %v1447_v48, %v4033_v42  ;;  %v1887_v42 = vld [vmem:[%s4306_s7 + $0x70] sm:$0xff]  ;;  %1945 = vmatpush.msra.mxu2 %v1923_v58 }
 0x37e   :  { %1897 = vmatpush.msra.mxu1 %v1887_v42 }
 0x37f   :  { %v1575_v39 = vpop.f32.mrf.mxu2  ;;  %v1521_v27 = vadd.f32 %v1509_v6, %v1448_v14  ;;  %v1653_v36 = vpop.f32.mrf.mxu3  ;;  %1946 = vmatpush.msra.mxu2 %v1922_v22 }
 0x380   :  { %v1591_v28 = vadd.f32 %v1575_v39, %v1519_v50  ;;  %v1917_v50 = vld [vmem:[%s4307_s9 + $0x8] sm:$0xff]  ;;  %v2420_v39 = vld [vmem:[%s4305_s8] ss:$0 sm:$0xff] }
 0x381   :  { %1947 = vmatpush.msra.mxu2 %v1921_v55 }
 0x382   :  { %v1663_v46 = vadd.f32 %v1647_v32, %v1591_v28 }
 0x383   :  { %1948 = vmatpush.msra.mxu2 %v1920_v17 }
 0x384   :  { %v1673_v34 = vmax.f32 %v4039_v62, %v1663_v46  ;;  %v2421_v46 = vld [vmem:[%s4308_s10] ss:$0 sm:$0xff] }
 0x385   :  { %1949 = vmatpush.msra.mxu2 %v1919_v3 }
 0x386   :  { %v1679_v54 = vmax.f32 %v1672_v43, %v1673_v34 }
 0x387   :  { %v1578_v63 = vpop.f32.mrf.mxu2  ;;  %1950 = vmatpush.msra.mxu2 %v1918_v13 }
 0x388   :  { %v1688_v57 = vadd.f32 %v4121_v20, %v1679_v54  ;;  %v1592_v0 = vadd.f32 %v1578_v63, %v1520_v30 }
 0x389   :  { %1951 = vmatpush.msra.mxu2 %v1917_v50 }
 0x38a   :  { %v1693_v51 = vmax.f32 %v1688_v57, 0.0  ;;  %v1664_v11 = vadd.f32 %v1650_v23, %v1592_v0 }
 0x38b   :  { %1952 = vmatpush.msra.mxu2 %v1916_v19 }
 0x38c   :  { %v1674_v33 = vmax.f32 %v4054_v15, %v1664_v11  ;;  %2398 = vmatmul.msk.f32.vlgmr.msra.gmra.mxu3 %vm1716_vm4, %v1693_v51  ;;  %v1886_v15 = vld [vmem:[%s4306_s7 + $0x68] sm:$0xff] }
 0x38d   :  { %1898 = vmatpush.msra.mxu1 %v1886_v15 }
 0x38f   :  { %v1581_v62 = vpop.f32.mrf.mxu2  ;;  %1899 = vmatpush.msra.mxu1 %v1885_v2 }
 0x390   :  { %v1593_v12 = vadd.f32 %v1581_v62, %v1521_v27 }
 0x392   :  { %v1665_v18 = vadd.f32 %v1653_v36, %v1593_v12 }
 0x394   :  { %v1675_v8 = vmax.f32 %v4081_v4, %v1665_v18  ;;  %v1884_v4 = vld [vmem:[%s4306_s7 + $0x58] sm:$0xff] }
 0x395   :  { %1900 = vmatpush.msra.mxu1 %v1884_v4 }
 0x396   :  { %v1680_v41 = vmax.f32 %v1674_v33, %v1675_v8 }
 0x398   :  { %v1689_v29 = vadd.f32 %v4121_v20, %v1680_v41  ;;  %v1883_v20 = vld [vmem:[%s4306_s7 + $0x50] sm:$0xff] }
 0x399   :  { %1901 = vmatpush.msra.mxu1 %v1883_v20 }
 0x39a   :  { %v1694_v25 = vmax.f32 %v1689_v29, 0.0 }
 0x39b   :  { %1902 = vmatpush.msra.mxu1 %v1882_v45 }
 0x39c   :  { %2409 = vmatmul.msk.f32.vlgmr.msra.gmra.mxu0 %vm1716_vm4, %v1694_v25 }
 0x39d   :  { %1903 = vmatpush.msra.mxu1 %v1881_v52 }
 0x39f   :  { %1904 = vmatpush.msra.mxu1 %v1880_v10 }
 0x3a1   :  { %1905 = vmatpush.msra.mxu1 %v1879_v61 }
 0x3a3   :  { %1906 = vmatpush.msra.mxu1 %v1878_v5 }
 0x3a5   :  { %1907 = vmatpush.msra.mxu1 %v1877_v40 }
 0x3a7   :  { %1908 = vmatpush.msra.mxu1 %v1876_v38 }
 0x3a9   :  { %1909 = vmatpush.msra.mxu1 %v1875_v16 }
 0x3ab   :  { %1910 = vmatpush.msra.mxu1 %v1874_v47 }
 0x3ad   :  { %1911 = vmatpush.msra.mxu1 %v1873_v26 }
 0x3d9   :  { %v1760_v24 = vpop.f32.mrf.mxu1 }
 0x3e9   :  { %v1737_v60 = vpop.f32.mrf.mxu0 }
 0x3ea   :  { %v1761_v44 = vadd.f32 %v1760_v24, %v1737_v60 }
 0x3ff   :  { %v1794_v31 = vpop.f32.mrf.mxu2 }
 0x400   :  { %v1797_v49 = vadd.f32 %v1794_v31, %v1761_v44 }
 0x40f   :  { %v1829_v35 = vpop.f32.mrf.mxu3 }
 0x410   :  { %v1832_v9 = vadd.f32 %v1829_v35, %v1797_v49 }
 0x419   :  { %v1864_v43 = vpop.f32.mrf.mxu0 }
 0x41a   :  { %v1867_v56 = vadd.f32 %v1864_v43, %v1832_v9 }
 0x41c   :  { %v1872_v32 = vadd.f32 %v2419_v21, %v1867_v56 }
 0x41e   :  { %2410 = vmatmul.msk.f32.vlgmr.msra.gmra.mxu1 %vm1892_vm5, %v1872_v32 }
 0x49b   :  { %v1913_v28 = vpop.f32.mrf.mxu1 }
 0x49c   :  { %v1914_v53 = vadd.f32 %v2420_v39, %v1913_v28 }
 0x49e   :  { %2412 = vmatmul.msk.f32.vlgmr.msra.gmra.mxu2 %vm966_vm3, %v1914_v53 }
 0x521   :  { %v1954_v34 = vpop.f32.mrf.mxu2 }
 0x522   :  { %v1955_v37 = vadd.f32 %v2421_v46, %v1954_v34 }
 0x524   :  { %1957 = vst [vmem:[%s4309_s11] sm:$0xff] %v1955_v37 }

</bundles_post_ra>
